<compile_context>
chip_gen: v7x
topology: tpu7x:2x2x1
jax: 0.10.0
libtpu: 0.0.40
codegen_flags: <defaults>
</compile_context>

<pallas_src>
import functools

import jax
import jax.numpy as jnp
from jax.experimental import pallas as pl
from jax.experimental.pallas import tpu as pltpu


# ---------------------------------------------------------------------------
# Kernel: one grid step == one batch element, full (N, D) tile resident in VMEM
# ---------------------------------------------------------------------------
def attention_kernel(x_ref, wqkv_ref, wout_ref, bout_ref, o_ref, acc_ref,
                     *, heads, dim_head, scale, project_out):
    x = x_ref[...]                                    # (N, D) f32 (batch dim squeezed)
    x_bf = x.astype(jnp.bfloat16)
    inner = heads * dim_head

    # Fused qkv projection (no bias): bf16 MXU inputs, f32 accumulation.
    # Last-dim layout: [q | k | v], each laid out as (h d).
    qkv = jnp.dot(x_bf, wqkv_ref[...], preferred_element_type=jnp.float32)   # (N, 3*inner)

    # Per-head attention; each head's output lands in a static lane slice of the
    # shared (N, inner) f32 VMEM scratch (no concatenate / no lane-sparse relayout).
    for h in range(heads):                            # static unroll over heads
        lo = h * dim_head
        q = (qkv[:, lo:lo + dim_head] * scale).astype(jnp.bfloat16)          # scale folded into q
        k = qkv[:, inner + lo:inner + lo + dim_head].astype(jnp.bfloat16)
        v = qkv[:, 2 * inner + lo:2 * inner + lo + dim_head].astype(jnp.bfloat16)

        dots = jnp.dot(q, k.T, preferred_element_type=jnp.float32)           # (N, N) f32
        dots = dots - jnp.max(dots, axis=-1, keepdims=True)                  # stable softmax
        e = jnp.exp(dots)
        inv_denom = pl.reciprocal(jnp.sum(e, axis=-1, keepdims=True), approx=True)
        attn = e * inv_denom                                                 # softmax(dim=-1)

        acc_ref[:, lo:lo + dim_head] = jnp.dot(
            attn.astype(jnp.bfloat16), v, preferred_element_type=jnp.float32)

    out = acc_ref[...]                                # (N, inner) f32 == 'b n (h d)'
    if project_out:
        y = jnp.dot(out.astype(jnp.bfloat16), wout_ref[...],
                    preferred_element_type=jnp.float32) + bout_ref[...]
    else:
        # heads == 1 and dim_head == dim  ->  nn.Identity()
        y = out
    o_ref[...] = y.astype(o_ref.dtype)


# ---------------------------------------------------------------------------
# pallas_call wrapper
# ---------------------------------------------------------------------------
def attention_forward(x, params, *, heads, dim_head):
    B, N, D = x.shape
    inner = heads * dim_head
    project_out = not (heads == 1 and dim_head == D)

    # Ship matmul weights to the kernel in bf16 (halves weight DMA); bias stays f32.
    w_qkv = params["w_qkv"].astype(jnp.bfloat16)      # (D, 3*inner)
    w_out = params["w_out"].astype(jnp.bfloat16)      # (inner, D)
    b_out = params["b_out"]                           # (1, D) f32

    kernel = functools.partial(
        attention_kernel, heads=heads, dim_head=dim_head,
        scale=dim_head ** (-0.5), project_out=project_out)

    return pl.pallas_call(
        kernel,
        out_shape=jax.ShapeDtypeStruct((B, N, D), x.dtype),
        grid=(B,),
        in_specs=[
            pl.BlockSpec((pl.Squeezed(), N, D), lambda b: (b, 0, 0)),   # x tile (batch squeezed)
            pl.BlockSpec(w_qkv.shape, lambda b: (0, 0)),                # weights: same block every step
            pl.BlockSpec(w_out.shape, lambda b: (0, 0)),
            pl.BlockSpec(b_out.shape, lambda b: (0, 0)),
        ],
        out_specs=pl.BlockSpec((pl.Squeezed(), N, D), lambda b: (b, 0, 0)),
        scratch_shapes=[pltpu.VMEM((N, inner), jnp.float32)],           # concatenated head outputs
        compiler_params=pltpu.CompilerParams(
            dimension_semantics=("parallel",),
            vmem_limit_bytes=64 * 1024 * 1024),
    )(x, w_qkv, w_out, b_out)


# ---------------------------------------------------------------------------
# Pure-JAX f32 reference (same math as the PyTorch module) for correctness check
# ---------------------------------------------------------------------------
def reference_forward(x, params, *, heads, dim_head):
    B, N, D = x.shape
    inner = heads * dim_head
    scale = dim_head ** (-0.5)

    qkv = x @ params["w_qkv"]
    q, k, v = jnp.split(qkv, 3, axis=-1)

    def to_heads(t):
        return t.reshape(B, N, heads, dim_head).transpose(0, 2, 1, 3)

    q, k, v = map(to_heads, (q, k, v))
    dots = jnp.einsum("bhnd,bhmd->bhnm", q, k) * scale
    attn = jax.nn.softmax(dots, axis=-1)
    out = jnp.einsum("bhnm,bhmd->bhnd", attn, v)
    out = out.transpose(0, 2, 1, 3).reshape(B, N, inner)
    if not (heads == 1 and dim_head == D):
        out = out @ params["w_out"] + params["b_out"]
    return out


if __name__ == "__main__":
    # Small shapes consistent with the module defaults (heads=8, dim_head=64),
    # with D = 128 so the output lane dimension is dense.
    B, N, dim = 2, 16, 128
    heads, dim_head = 8, 64
    inner = heads * dim_head

    key = jax.random.PRNGKey(0)
    kx, k0, k1 = jax.random.split(key, 3)
    x = jax.random.normal(kx, (B, N, dim), jnp.float32)
    params = {
        "w_qkv": 0.05 * jax.random.normal(k0, (dim, 3 * inner), jnp.float32),
        "w_out": 0.05 * jax.random.normal(k1, (inner, dim), jnp.float32),
        "b_out": 0.02 * jnp.ones((1, dim), jnp.float32),
    }

    out = attention_forward(x, params, heads=heads, dim_head=dim_head)
    out = jax.block_until_ready(out)

    ref = reference_forward(x, params, heads=heads, dim_head=dim_head)
    assert out.shape == (B, N, dim)

    # bf16 matmul inputs + approx reciprocal introduce small numeric deltas vs f32 reference.
    err = float(jnp.max(jnp.abs(out - ref)))
    ref_scale = float(jnp.max(jnp.abs(ref))) + 1e-6
    assert err < 5e-2 * ref_scale + 1e-3, f"Pallas output mismatch vs reference (abs err {err})"

    print("KERNEL_OK")
</pallas_src>

<mosaic_0001>
module attributes {stable_mosaic.version = 11 : i64} {
  func.func @attention_kernel(%arg0: i32, %arg1: memref<1x16x128xf32, #tpu.memory_space<vmem>>, %arg2: memref<128x1536xbf16, #tpu.memory_space<vmem>>, %arg3: memref<512x128xbf16, #tpu.memory_space<vmem>>, %arg4: memref<1x128xf32, #tpu.memory_space<vmem>>, %arg5: memref<1x16x128xf32, #tpu.memory_space<vmem>>, %arg6: memref<16x512xf32, #tpu.memory_space<vmem>>) attributes {dimension_semantics = [#tpu.dimension_semantics<parallel>], iteration_bounds = array<i64: 2>, scalar_prefetch = 0 : i64, scratch_operands = 1 : i64, tpu.core_type = #tpu.core_type<tc>, window_params = [{transform_indices = @transform_0, window_bounds = array<i64: 1, 16, 128>}, {pipeline_mode = #tpu.pipeline_mode<synchronous>, transform_indices = @transform_1, window_bounds = array<i64: 128, 1536>}, {pipeline_mode = #tpu.pipeline_mode<synchronous>, transform_indices = @transform_2, window_bounds = array<i64: 512, 128>}, {pipeline_mode = #tpu.pipeline_mode<synchronous>, transform_indices = @transform_3, window_bounds = array<i64: 1, 128>}, {transform_indices = @transform_4, window_bounds = array<i64: 1, 16, 128>}]} {
    %c0 = arith.constant 0 : index
    %c0_0 = arith.constant 0 : index
    %c0_1 = arith.constant 0 : index
    %0 = vector.load %arg1[%c0, %c0_0, %c0_1] : memref<1x16x128xf32, #tpu.memory_space<vmem>>, vector<1x16x128xf32>
    %1 = vector.shape_cast %0 : vector<1x16x128xf32> to vector<16x128xf32>
    %2 = arith.truncf %1 : vector<16x128xf32> to vector<16x128xbf16>
    %c0_2 = arith.constant 0 : index
    %c0_3 = arith.constant 0 : index
    %3 = vector.load %arg2[%c0_2, %c0_3] : memref<128x1536xbf16, #tpu.memory_space<vmem>>, vector<128x1536xbf16>
    %cst = arith.constant dense<0.000000e+00> : vector<16x1536xf32>
    %4 = tpu.matmul %2, %3, %cst {dimension_numbers = #tpu.dot_dimension_numbers<[1], [0], [0], [1], [0, 0, 1, 1], [], []>} : vector<16x128xbf16>, vector<128x1536xbf16>, vector<16x1536xf32> -> vector<16x1536xf32>
    %5 = vector.extract_strided_slice %4 {offsets = [0, 0], sizes = [16, 64], strides = [1, 1]} : vector<16x1536xf32> to vector<16x64xf32>
    %cst_4 = arith.constant 1.250000e-01 : f32
    %6 = vector.broadcast %cst_4 : f32 to vector<16x64xf32>
    %7 = arith.mulf %5, %6 : vector<16x64xf32>
    %8 = arith.truncf %7 : vector<16x64xf32> to vector<16x64xbf16>
    %9 = vector.extract_strided_slice %4 {offsets = [0, 512], sizes = [16, 64], strides = [1, 1]} : vector<16x1536xf32> to vector<16x64xf32>
    %10 = arith.truncf %9 : vector<16x64xf32> to vector<16x64xbf16>
    %11 = vector.extract_strided_slice %4 {offsets = [0, 1024], sizes = [16, 64], strides = [1, 1]} : vector<16x1536xf32> to vector<16x64xf32>
    %12 = arith.truncf %11 : vector<16x64xf32> to vector<16x64xbf16>
    %13 = tpu.transpose %10, [1, 0] : vector<16x64xbf16> -> vector<64x16xbf16>
    %cst_5 = arith.constant dense<0.000000e+00> : vector<16x16xf32>
    %14 = tpu.matmul %8, %13, %cst_5 {dimension_numbers = #tpu.dot_dimension_numbers<[1], [0], [0], [1], [0, 0, 1, 1], [], []>} : vector<16x64xbf16>, vector<64x16xbf16>, vector<16x16xf32> -> vector<16x16xf32>
    %cst_6 = arith.constant dense<0xFF800000> : vector<16xf32>
    %15 = vector.multi_reduction <maximumf>, %14, %cst_6 [1] : vector<16x16xf32> to vector<16xf32>
    %16 = vector.shape_cast %15 : vector<16xf32> to vector<16x1xf32>
    %17 = vector.broadcast %16 : vector<16x1xf32> to vector<16x16xf32>
    %18 = arith.subf %14, %17 : vector<16x16xf32>
    %19 = math.exp %18 : vector<16x16xf32>
    %cst_7 = arith.constant dense<0.000000e+00> : vector<16xf32>
    %20 = vector.multi_reduction <add>, %19, %cst_7 [1] : vector<16x16xf32> to vector<16xf32>
    %21 = vector.shape_cast %20 : vector<16xf32> to vector<16x1xf32>
    %22 = tpu.reciprocal %21 {approx = true} : vector<16x1xf32> -> vector<16x1xf32>
    %23 = vector.broadcast %22 : vector<16x1xf32> to vector<16x16xf32>
    %24 = arith.mulf %19, %23 : vector<16x16xf32>
    %25 = arith.truncf %24 : vector<16x16xf32> to vector<16x16xbf16>
    %cst_8 = arith.constant dense<0.000000e+00> : vector<16x64xf32>
    %26 = tpu.matmul %25, %12, %cst_8 {dimension_numbers = #tpu.dot_dimension_numbers<[1], [0], [0], [1], [0, 0, 1, 1], [], []>} : vector<16x16xbf16>, vector<16x64xbf16>, vector<16x64xf32> -> vector<16x64xf32>
    %c0_9 = arith.constant 0 : index
    %c0_10 = arith.constant 0 : index
    %27 = vector.load %arg6[%c0_9, %c0_10] : memref<16x512xf32, #tpu.memory_space<vmem>>, vector<16x64xf32>
    tpu.vector_store %arg6[%c0_9, %c0_10], %26 {strides = array<i32>} : memref<16x512xf32, #tpu.memory_space<vmem>>, vector<16x64xf32>,
    %28 = vector.extract_strided_slice %4 {offsets = [0, 64], sizes = [16, 64], strides = [1, 1]} : vector<16x1536xf32> to vector<16x64xf32>
    %cst_11 = arith.constant 1.250000e-01 : f32
    %29 = vector.broadcast %cst_11 : f32 to vector<16x64xf32>
    %30 = arith.mulf %28, %29 : vector<16x64xf32>
    %31 = arith.truncf %30 : vector<16x64xf32> to vector<16x64xbf16>
    %32 = vector.extract_strided_slice %4 {offsets = [0, 576], sizes = [16, 64], strides = [1, 1]} : vector<16x1536xf32> to vector<16x64xf32>
    %33 = arith.truncf %32 : vector<16x64xf32> to vector<16x64xbf16>
    %34 = vector.extract_strided_slice %4 {offsets = [0, 1088], sizes = [16, 64], strides = [1, 1]} : vector<16x1536xf32> to vector<16x64xf32>
    %35 = arith.truncf %34 : vector<16x64xf32> to vector<16x64xbf16>
    %36 = tpu.transpose %33, [1, 0] : vector<16x64xbf16> -> vector<64x16xbf16>
    %cst_12 = arith.constant dense<0.000000e+00> : vector<16x16xf32>
    %37 = tpu.matmul %31, %36, %cst_12 {dimension_numbers = #tpu.dot_dimension_numbers<[1], [0], [0], [1], [0, 0, 1, 1], [], []>} : vector<16x64xbf16>, vector<64x16xbf16>, vector<16x16xf32> -> vector<16x16xf32>
    %cst_13 = arith.constant dense<0xFF800000> : vector<16xf32>
    %38 = vector.multi_reduction <maximumf>, %37, %cst_13 [1] : vector<16x16xf32> to vector<16xf32>
    %39 = vector.shape_cast %38 : vector<16xf32> to vector<16x1xf32>
    %40 = vector.broadcast %39 : vector<16x1xf32> to vector<16x16xf32>
    %41 = arith.subf %37, %40 : vector<16x16xf32>
    %42 = math.exp %41 : vector<16x16xf32>
    %cst_14 = arith.constant dense<0.000000e+00> : vector<16xf32>
    %43 = vector.multi_reduction <add>, %42, %cst_14 [1] : vector<16x16xf32> to vector<16xf32>
    %44 = vector.shape_cast %43 : vector<16xf32> to vector<16x1xf32>
    %45 = tpu.reciprocal %44 {approx = true} : vector<16x1xf32> -> vector<16x1xf32>
    %46 = vector.broadcast %45 : vector<16x1xf32> to vector<16x16xf32>
    %47 = arith.mulf %42, %46 : vector<16x16xf32>
    %48 = arith.truncf %47 : vector<16x16xf32> to vector<16x16xbf16>
    %cst_15 = arith.constant dense<0.000000e+00> : vector<16x64xf32>
    %49 = tpu.matmul %48, %35, %cst_15 {dimension_numbers = #tpu.dot_dimension_numbers<[1], [0], [0], [1], [0, 0, 1, 1], [], []>} : vector<16x16xbf16>, vector<16x64xbf16>, vector<16x64xf32> -> vector<16x64xf32>
    %c0_16 = arith.constant 0 : index
    %c64 = arith.constant 64 : index
    %50 = vector.load %arg6[%c0_16, %c64] : memref<16x512xf32, #tpu.memory_space<vmem>>, vector<16x64xf32>
    tpu.vector_store %arg6[%c0_16, %c64], %49 {strides = array<i32>} : memref<16x512xf32, #tpu.memory_space<vmem>>, vector<16x64xf32>,
    %51 = vector.extract_strided_slice %4 {offsets = [0, 128], sizes = [16, 64], strides = [1, 1]} : vector<16x1536xf32> to vector<16x64xf32>
    %cst_17 = arith.constant 1.250000e-01 : f32
    %52 = vector.broadcast %cst_17 : f32 to vector<16x64xf32>
    %53 = arith.mulf %51, %52 : vector<16x64xf32>
    %54 = arith.truncf %53 : vector<16x64xf32> to vector<16x64xbf16>
    %55 = vector.extract_strided_slice %4 {offsets = [0, 640], sizes = [16, 64], strides = [1, 1]} : vector<16x1536xf32> to vector<16x64xf32>
    %56 = arith.truncf %55 : vector<16x64xf32> to vector<16x64xbf16>
    %57 = vector.extract_strided_slice %4 {offsets = [0, 1152], sizes = [16, 64], strides = [1, 1]} : vector<16x1536xf32> to vector<16x64xf32>
    %58 = arith.truncf %57 : vector<16x64xf32> to vector<16x64xbf16>
    %59 = tpu.transpose %56, [1, 0] : vector<16x64xbf16> -> vector<64x16xbf16>
    %cst_18 = arith.constant dense<0.000000e+00> : vector<16x16xf32>
    %60 = tpu.matmul %54, %59, %cst_18 {dimension_numbers = #tpu.dot_dimension_numbers<[1], [0], [0], [1], [0, 0, 1, 1], [], []>} : vector<16x64xbf16>, vector<64x16xbf16>, vector<16x16xf32> -> vector<16x16xf32>
    %cst_19 = arith.constant dense<0xFF800000> : vector<16xf32>
    %61 = vector.multi_reduction <maximumf>, %60, %cst_19 [1] : vector<16x16xf32> to vector<16xf32>
    %62 = vector.shape_cast %61 : vector<16xf32> to vector<16x1xf32>
    %63 = vector.broadcast %62 : vector<16x1xf32> to vector<16x16xf32>
    %64 = arith.subf %60, %63 : vector<16x16xf32>
    %65 = math.exp %64 : vector<16x16xf32>
    %cst_20 = arith.constant dense<0.000000e+00> : vector<16xf32>
    %66 = vector.multi_reduction <add>, %65, %cst_20 [1] : vector<16x16xf32> to vector<16xf32>
    %67 = vector.shape_cast %66 : vector<16xf32> to vector<16x1xf32>
    %68 = tpu.reciprocal %67 {approx = true} : vector<16x1xf32> -> vector<16x1xf32>
    %69 = vector.broadcast %68 : vector<16x1xf32> to vector<16x16xf32>
    %70 = arith.mulf %65, %69 : vector<16x16xf32>
    %71 = arith.truncf %70 : vector<16x16xf32> to vector<16x16xbf16>
    %cst_21 = arith.constant dense<0.000000e+00> : vector<16x64xf32>
    %72 = tpu.matmul %71, %58, %cst_21 {dimension_numbers = #tpu.dot_dimension_numbers<[1], [0], [0], [1], [0, 0, 1, 1], [], []>} : vector<16x16xbf16>, vector<16x64xbf16>, vector<16x64xf32> -> vector<16x64xf32>
    %c0_22 = arith.constant 0 : index
    %c128 = arith.constant 128 : index
    %73 = vector.load %arg6[%c0_22, %c128] : memref<16x512xf32, #tpu.memory_space<vmem>>, vector<16x64xf32>
    tpu.vector_store %arg6[%c0_22, %c128], %72 {strides = array<i32>} : memref<16x512xf32, #tpu.memory_space<vmem>>, vector<16x64xf32>,
    %74 = vector.extract_strided_slice %4 {offsets = [0, 192], sizes = [16, 64], strides = [1, 1]} : vector<16x1536xf32> to vector<16x64xf32>
    %cst_23 = arith.constant 1.250000e-01 : f32
    %75 = vector.broadcast %cst_23 : f32 to vector<16x64xf32>
    %76 = arith.mulf %74, %75 : vector<16x64xf32>
    %77 = arith.truncf %76 : vector<16x64xf32> to vector<16x64xbf16>
    %78 = vector.extract_strided_slice %4 {offsets = [0, 704], sizes = [16, 64], strides = [1, 1]} : vector<16x1536xf32> to vector<16x64xf32>
    %79 = arith.truncf %78 : vector<16x64xf32> to vector<16x64xbf16>
    %80 = vector.extract_strided_slice %4 {offsets = [0, 1216], sizes = [16, 64], strides = [1, 1]} : vector<16x1536xf32> to vector<16x64xf32>
    %81 = arith.truncf %80 : vector<16x64xf32> to vector<16x64xbf16>
    %82 = tpu.transpose %79, [1, 0] : vector<16x64xbf16> -> vector<64x16xbf16>
    %cst_24 = arith.constant dense<0.000000e+00> : vector<16x16xf32>
    %83 = tpu.matmul %77, %82, %cst_24 {dimension_numbers = #tpu.dot_dimension_numbers<[1], [0], [0], [1], [0, 0, 1, 1], [], []>} : vector<16x64xbf16>, vector<64x16xbf16>, vector<16x16xf32> -> vector<16x16xf32>
    %cst_25 = arith.constant dense<0xFF800000> : vector<16xf32>
    %84 = vector.multi_reduction <maximumf>, %83, %cst_25 [1] : vector<16x16xf32> to vector<16xf32>
    %85 = vector.shape_cast %84 : vector<16xf32> to vector<16x1xf32>
    %86 = vector.broadcast %85 : vector<16x1xf32> to vector<16x16xf32>
    %87 = arith.subf %83, %86 : vector<16x16xf32>
    %88 = math.exp %87 : vector<16x16xf32>
    %cst_26 = arith.constant dense<0.000000e+00> : vector<16xf32>
    %89 = vector.multi_reduction <add>, %88, %cst_26 [1] : vector<16x16xf32> to vector<16xf32>
    %90 = vector.shape_cast %89 : vector<16xf32> to vector<16x1xf32>
    %91 = tpu.reciprocal %90 {approx = true} : vector<16x1xf32> -> vector<16x1xf32>
    %92 = vector.broadcast %91 : vector<16x1xf32> to vector<16x16xf32>
    %93 = arith.mulf %88, %92 : vector<16x16xf32>
    %94 = arith.truncf %93 : vector<16x16xf32> to vector<16x16xbf16>
    %cst_27 = arith.constant dense<0.000000e+00> : vector<16x64xf32>
    %95 = tpu.matmul %94, %81, %cst_27 {dimension_numbers = #tpu.dot_dimension_numbers<[1], [0], [0], [1], [0, 0, 1, 1], [], []>} : vector<16x16xbf16>, vector<16x64xbf16>, vector<16x64xf32> -> vector<16x64xf32>
    %c0_28 = arith.constant 0 : index
    %c192 = arith.constant 192 : index
    %96 = vector.load %arg6[%c0_28, %c192] : memref<16x512xf32, #tpu.memory_space<vmem>>, vector<16x64xf32>
    tpu.vector_store %arg6[%c0_28, %c192], %95 {strides = array<i32>} : memref<16x512xf32, #tpu.memory_space<vmem>>, vector<16x64xf32>,
    %97 = vector.extract_strided_slice %4 {offsets = [0, 256], sizes = [16, 64], strides = [1, 1]} : vector<16x1536xf32> to vector<16x64xf32>
    %cst_29 = arith.constant 1.250000e-01 : f32
    %98 = vector.broadcast %cst_29 : f32 to vector<16x64xf32>
    %99 = arith.mulf %97, %98 : vector<16x64xf32>
    %100 = arith.truncf %99 : vector<16x64xf32> to vector<16x64xbf16>
    %101 = vector.extract_strided_slice %4 {offsets = [0, 768], sizes = [16, 64], strides = [1, 1]} : vector<16x1536xf32> to vector<16x64xf32>
    %102 = arith.truncf %101 : vector<16x64xf32> to vector<16x64xbf16>
    %103 = vector.extract_strided_slice %4 {offsets = [0, 1280], sizes = [16, 64], strides = [1, 1]} : vector<16x1536xf32> to vector<16x64xf32>
    %104 = arith.truncf %103 : vector<16x64xf32> to vector<16x64xbf16>
    %105 = tpu.transpose %102, [1, 0] : vector<16x64xbf16> -> vector<64x16xbf16>
    %cst_30 = arith.constant dense<0.000000e+00> : vector<16x16xf32>
    %106 = tpu.matmul %100, %105, %cst_30 {dimension_numbers = #tpu.dot_dimension_numbers<[1], [0], [0], [1], [0, 0, 1, 1], [], []>} : vector<16x64xbf16>, vector<64x16xbf16>, vector<16x16xf32> -> vector<16x16xf32>
    %cst_31 = arith.constant dense<0xFF800000> : vector<16xf32>
    %107 = vector.multi_reduction <maximumf>, %106, %cst_31 [1] : vector<16x16xf32> to vector<16xf32>
    %108 = vector.shape_cast %107 : vector<16xf32> to vector<16x1xf32>
    %109 = vector.broadcast %108 : vector<16x1xf32> to vector<16x16xf32>
    %110 = arith.subf %106, %109 : vector<16x16xf32>
    %111 = math.exp %110 : vector<16x16xf32>
    %cst_32 = arith.constant dense<0.000000e+00> : vector<16xf32>
    %112 = vector.multi_reduction <add>, %111, %cst_32 [1] : vector<16x16xf32> to vector<16xf32>
    %113 = vector.shape_cast %112 : vector<16xf32> to vector<16x1xf32>
    %114 = tpu.reciprocal %113 {approx = true} : vector<16x1xf32> -> vector<16x1xf32>
    %115 = vector.broadcast %114 : vector<16x1xf32> to vector<16x16xf32>
    %116 = arith.mulf %111, %115 : vector<16x16xf32>
    %117 = arith.truncf %116 : vector<16x16xf32> to vector<16x16xbf16>
    %cst_33 = arith.constant dense<0.000000e+00> : vector<16x64xf32>
    %118 = tpu.matmul %117, %104, %cst_33 {dimension_numbers = #tpu.dot_dimension_numbers<[1], [0], [0], [1], [0, 0, 1, 1], [], []>} : vector<16x16xbf16>, vector<16x64xbf16>, vector<16x64xf32> -> vector<16x64xf32>
    %c0_34 = arith.constant 0 : index
    %c256 = arith.constant 256 : index
    %119 = vector.load %arg6[%c0_34, %c256] : memref<16x512xf32, #tpu.memory_space<vmem>>, vector<16x64xf32>
    tpu.vector_store %arg6[%c0_34, %c256], %118 {strides = array<i32>} : memref<16x512xf32, #tpu.memory_space<vmem>>, vector<16x64xf32>,
    %120 = vector.extract_strided_slice %4 {offsets = [0, 320], sizes = [16, 64], strides = [1, 1]} : vector<16x1536xf32> to vector<16x64xf32>
    %cst_35 = arith.constant 1.250000e-01 : f32
    %121 = vector.broadcast %cst_35 : f32 to vector<16x64xf32>
    %122 = arith.mulf %120, %121 : vector<16x64xf32>
    %123 = arith.truncf %122 : vector<16x64xf32> to vector<16x64xbf16>
    %124 = vector.extract_strided_slice %4 {offsets = [0, 832], sizes = [16, 64], strides = [1, 1]} : vector<16x1536xf32> to vector<16x64xf32>
    %125 = arith.truncf %124 : vector<16x64xf32> to vector<16x64xbf16>
    %126 = vector.extract_strided_slice %4 {offsets = [0, 1344], sizes = [16, 64], strides = [1, 1]} : vector<16x1536xf32> to vector<16x64xf32>
    %127 = arith.truncf %126 : vector<16x64xf32> to vector<16x64xbf16>
    %128 = tpu.transpose %125, [1, 0] : vector<16x64xbf16> -> vector<64x16xbf16>
    %cst_36 = arith.constant dense<0.000000e+00> : vector<16x16xf32>
    %129 = tpu.matmul %123, %128, %cst_36 {dimension_numbers = #tpu.dot_dimension_numbers<[1], [0], [0], [1], [0, 0, 1, 1], [], []>} : vector<16x64xbf16>, vector<64x16xbf16>, vector<16x16xf32> -> vector<16x16xf32>
    %cst_37 = arith.constant dense<0xFF800000> : vector<16xf32>
    %130 = vector.multi_reduction <maximumf>, %129, %cst_37 [1] : vector<16x16xf32> to vector<16xf32>
    %131 = vector.shape_cast %130 : vector<16xf32> to vector<16x1xf32>
    %132 = vector.broadcast %131 : vector<16x1xf32> to vector<16x16xf32>
    %133 = arith.subf %129, %132 : vector<16x16xf32>
    %134 = math.exp %133 : vector<16x16xf32>
    %cst_38 = arith.constant dense<0.000000e+00> : vector<16xf32>
    %135 = vector.multi_reduction <add>, %134, %cst_38 [1] : vector<16x16xf32> to vector<16xf32>
    %136 = vector.shape_cast %135 : vector<16xf32> to vector<16x1xf32>
    %137 = tpu.reciprocal %136 {approx = true} : vector<16x1xf32> -> vector<16x1xf32>
    %138 = vector.broadcast %137 : vector<16x1xf32> to vector<16x16xf32>
    %139 = arith.mulf %134, %138 : vector<16x16xf32>
    %140 = arith.truncf %139 : vector<16x16xf32> to vector<16x16xbf16>
    %cst_39 = arith.constant dense<0.000000e+00> : vector<16x64xf32>
    %141 = tpu.matmul %140, %127, %cst_39 {dimension_numbers = #tpu.dot_dimension_numbers<[1], [0], [0], [1], [0, 0, 1, 1], [], []>} : vector<16x16xbf16>, vector<16x64xbf16>, vector<16x64xf32> -> vector<16x64xf32>
    %c0_40 = arith.constant 0 : index
    %c320 = arith.constant 320 : index
    %142 = vector.load %arg6[%c0_40, %c320] : memref<16x512xf32, #tpu.memory_space<vmem>>, vector<16x64xf32>
    tpu.vector_store %arg6[%c0_40, %c320], %141 {strides = array<i32>} : memref<16x512xf32, #tpu.memory_space<vmem>>, vector<16x64xf32>,
    %143 = vector.extract_strided_slice %4 {offsets = [0, 384], sizes = [16, 64], strides = [1, 1]} : vector<16x1536xf32> to vector<16x64xf32>
    %cst_41 = arith.constant 1.250000e-01 : f32
    %144 = vector.broadcast %cst_41 : f32 to vector<16x64xf32>
    %145 = arith.mulf %143, %144 : vector<16x64xf32>
    %146 = arith.truncf %145 : vector<16x64xf32> to vector<16x64xbf16>
    %147 = vector.extract_strided_slice %4 {offsets = [0, 896], sizes = [16, 64], strides = [1, 1]} : vector<16x1536xf32> to vector<16x64xf32>
    %148 = arith.truncf %147 : vector<16x64xf32> to vector<16x64xbf16>
    %149 = vector.extract_strided_slice %4 {offsets = [0, 1408], sizes = [16, 64], strides = [1, 1]} : vector<16x1536xf32> to vector<16x64xf32>
    %150 = arith.truncf %149 : vector<16x64xf32> to vector<16x64xbf16>
    %151 = tpu.transpose %148, [1, 0] : vector<16x64xbf16> -> vector<64x16xbf16>
    %cst_42 = arith.constant dense<0.000000e+00> : vector<16x16xf32>
    %152 = tpu.matmul %146, %151, %cst_42 {dimension_numbers = #tpu.dot_dimension_numbers<[1], [0], [0], [1], [0, 0, 1, 1], [], []>} : vector<16x64xbf16>, vector<64x16xbf16>, vector<16x16xf32> -> vector<16x16xf32>
    %cst_43 = arith.constant dense<0xFF800000> : vector<16xf32>
    %153 = vector.multi_reduction <maximumf>, %152, %cst_43 [1] : vector<16x16xf32> to vector<16xf32>
    %154 = vector.shape_cast %153 : vector<16xf32> to vector<16x1xf32>
    %155 = vector.broadcast %154 : vector<16x1xf32> to vector<16x16xf32>
    %156 = arith.subf %152, %155 : vector<16x16xf32>
    %157 = math.exp %156 : vector<16x16xf32>
    %cst_44 = arith.constant dense<0.000000e+00> : vector<16xf32>
    %158 = vector.multi_reduction <add>, %157, %cst_44 [1] : vector<16x16xf32> to vector<16xf32>
    %159 = vector.shape_cast %158 : vector<16xf32> to vector<16x1xf32>
    %160 = tpu.reciprocal %159 {approx = true} : vector<16x1xf32> -> vector<16x1xf32>
    %161 = vector.broadcast %160 : vector<16x1xf32> to vector<16x16xf32>
    %162 = arith.mulf %157, %161 : vector<16x16xf32>
    %163 = arith.truncf %162 : vector<16x16xf32> to vector<16x16xbf16>
    %cst_45 = arith.constant dense<0.000000e+00> : vector<16x64xf32>
    %164 = tpu.matmul %163, %150, %cst_45 {dimension_numbers = #tpu.dot_dimension_numbers<[1], [0], [0], [1], [0, 0, 1, 1], [], []>} : vector<16x16xbf16>, vector<16x64xbf16>, vector<16x64xf32> -> vector<16x64xf32>
    %c0_46 = arith.constant 0 : index
    %c384 = arith.constant 384 : index
    %165 = vector.load %arg6[%c0_46, %c384] : memref<16x512xf32, #tpu.memory_space<vmem>>, vector<16x64xf32>
    tpu.vector_store %arg6[%c0_46, %c384], %164 {strides = array<i32>} : memref<16x512xf32, #tpu.memory_space<vmem>>, vector<16x64xf32>,
    %166 = vector.extract_strided_slice %4 {offsets = [0, 448], sizes = [16, 64], strides = [1, 1]} : vector<16x1536xf32> to vector<16x64xf32>
    %cst_47 = arith.constant 1.250000e-01 : f32
    %167 = vector.broadcast %cst_47 : f32 to vector<16x64xf32>
    %168 = arith.mulf %166, %167 : vector<16x64xf32>
    %169 = arith.truncf %168 : vector<16x64xf32> to vector<16x64xbf16>
    %170 = vector.extract_strided_slice %4 {offsets = [0, 960], sizes = [16, 64], strides = [1, 1]} : vector<16x1536xf32> to vector<16x64xf32>
    %171 = arith.truncf %170 : vector<16x64xf32> to vector<16x64xbf16>
    %172 = vector.extract_strided_slice %4 {offsets = [0, 1472], sizes = [16, 64], strides = [1, 1]} : vector<16x1536xf32> to vector<16x64xf32>
    %173 = arith.truncf %172 : vector<16x64xf32> to vector<16x64xbf16>
    %174 = tpu.transpose %171, [1, 0] : vector<16x64xbf16> -> vector<64x16xbf16>
    %cst_48 = arith.constant dense<0.000000e+00> : vector<16x16xf32>
    %175 = tpu.matmul %169, %174, %cst_48 {dimension_numbers = #tpu.dot_dimension_numbers<[1], [0], [0], [1], [0, 0, 1, 1], [], []>} : vector<16x64xbf16>, vector<64x16xbf16>, vector<16x16xf32> -> vector<16x16xf32>
    %cst_49 = arith.constant dense<0xFF800000> : vector<16xf32>
    %176 = vector.multi_reduction <maximumf>, %175, %cst_49 [1] : vector<16x16xf32> to vector<16xf32>
    %177 = vector.shape_cast %176 : vector<16xf32> to vector<16x1xf32>
    %178 = vector.broadcast %177 : vector<16x1xf32> to vector<16x16xf32>
    %179 = arith.subf %175, %178 : vector<16x16xf32>
    %180 = math.exp %179 : vector<16x16xf32>
    %cst_50 = arith.constant dense<0.000000e+00> : vector<16xf32>
    %181 = vector.multi_reduction <add>, %180, %cst_50 [1] : vector<16x16xf32> to vector<16xf32>
    %182 = vector.shape_cast %181 : vector<16xf32> to vector<16x1xf32>
    %183 = tpu.reciprocal %182 {approx = true} : vector<16x1xf32> -> vector<16x1xf32>
    %184 = vector.broadcast %183 : vector<16x1xf32> to vector<16x16xf32>
    %185 = arith.mulf %180, %184 : vector<16x16xf32>
    %186 = arith.truncf %185 : vector<16x16xf32> to vector<16x16xbf16>
    %cst_51 = arith.constant dense<0.000000e+00> : vector<16x64xf32>
    %187 = tpu.matmul %186, %173, %cst_51 {dimension_numbers = #tpu.dot_dimension_numbers<[1], [0], [0], [1], [0, 0, 1, 1], [], []>} : vector<16x16xbf16>, vector<16x64xbf16>, vector<16x64xf32> -> vector<16x64xf32>
    %c0_52 = arith.constant 0 : index
    %c448 = arith.constant 448 : index
    %188 = vector.load %arg6[%c0_52, %c448] : memref<16x512xf32, #tpu.memory_space<vmem>>, vector<16x64xf32>
    tpu.vector_store %arg6[%c0_52, %c448], %187 {strides = array<i32>} : memref<16x512xf32, #tpu.memory_space<vmem>>, vector<16x64xf32>,
    %c0_53 = arith.constant 0 : index
    %c0_54 = arith.constant 0 : index
    %189 = vector.load %arg6[%c0_53, %c0_54] : memref<16x512xf32, #tpu.memory_space<vmem>>, vector<16x512xf32>
    %190 = arith.truncf %189 : vector<16x512xf32> to vector<16x512xbf16>
    %c0_55 = arith.constant 0 : index
    %c0_56 = arith.constant 0 : index
    %191 = vector.load %arg3[%c0_55, %c0_56] : memref<512x128xbf16, #tpu.memory_space<vmem>>, vector<512x128xbf16>
    %cst_57 = arith.constant dense<0.000000e+00> : vector<16x128xf32>
    %192 = tpu.matmul %190, %191, %cst_57 {dimension_numbers = #tpu.dot_dimension_numbers<[1], [0], [0], [1], [0, 0, 1, 1], [], []>} : vector<16x512xbf16>, vector<512x128xbf16>, vector<16x128xf32> -> vector<16x128xf32>
    %c0_58 = arith.constant 0 : index
    %c0_59 = arith.constant 0 : index
    %193 = vector.load %arg4[%c0_58, %c0_59] : memref<1x128xf32, #tpu.memory_space<vmem>>, vector<1x128xf32>
    %194 = vector.broadcast %193 : vector<1x128xf32> to vector<16x128xf32>
    %195 = arith.addf %192, %194 : vector<16x128xf32>
    %c0_60 = arith.constant 0 : index
    %c0_61 = arith.constant 0 : index
    %c0_62 = arith.constant 0 : index
    %196 = vector.load %arg5[%c0_60, %c0_61, %c0_62] : memref<1x16x128xf32, #tpu.memory_space<vmem>>, vector<1x16x128xf32>
    %197 = vector.shape_cast %196 : vector<1x16x128xf32> to vector<16x128xf32>
    %198 = vector.shape_cast %195 : vector<16x128xf32> to vector<1x16x128xf32>
    tpu.vector_store %arg5[%c0_60, %c0_61, %c0_62], %198 {strides = array<i32>} : memref<1x16x128xf32, #tpu.memory_space<vmem>>, vector<1x16x128xf32>,
    return
  }
  func.func @transform_0(%arg0: i32) -> (i32, i32, i32) {
    %c0_i32 = arith.constant 0 : i32
    %c0_i32_0 = arith.constant 0 : i32
    %c0_i32_1 = arith.constant 0 : i32
    return %arg0, %c0_i32, %c0_i32_0 : i32, i32, i32
  }
  func.func @transform_1(%arg0: i32) -> (i32, i32) {
    %c0_i32 = arith.constant 0 : i32
    %c0_i32_0 = arith.constant 0 : i32
    %c0_i32_1 = arith.constant 0 : i32
    return %c0_i32, %c0_i32_0 : i32, i32
  }
  func.func @transform_2(%arg0: i32) -> (i32, i32) {
    %c0_i32 = arith.constant 0 : i32
    %c0_i32_0 = arith.constant 0 : i32
    %c0_i32_1 = arith.constant 0 : i32
    return %c0_i32, %c0_i32_0 : i32, i32
  }
  func.func @transform_3(%arg0: i32) -> (i32, i32) {
    %c0_i32 = arith.constant 0 : i32
    %c0_i32_0 = arith.constant 0 : i32
    %c0_i32_1 = arith.constant 0 : i32
    return %c0_i32, %c0_i32_0 : i32, i32
  }
  func.func @transform_4(%arg0: i32) -> (i32, i32, i32) {
    %c0_i32 = arith.constant 0 : i32
    %c0_i32_0 = arith.constant 0 : i32
    %c0_i32_1 = arith.constant 0 : i32
    return %arg0, %c0_i32, %c0_i32_0 : i32, i32, i32
  }
}

</mosaic_0001>

<bundles_post_ra>
// kernel: tpu_custom_call.1
= control target key start
LH: loop header
LB: loop body
LE: loop exit
PB: predicated region body
PF: predicated region fallthrough
CT: control target
= control target key end

     0   :  { %9 = vsyncpa [#allocation4], 0  ;;  %s4068_s0 = inlined_call_operand.hbm [shape: f32[2,16,128], index: 0, kind: input, shape index: {}]   ;;  %s4069_s1 = inlined_call_operand.hbm [shape: bf16[128,1536], index: 1, kind: input, shape index: {}]   ;;  %s4070_s2 = inlined_call_operand.hbm [shape: bf16[512,128], index: 2, kind: input, shape index: {}]   ;;  %s4071_s3 = inlined_call_operand.hbm [shape: f32[1,128], index: 3, kind: input, shape index: {}]   ;;  %s4072_s4 = inlined_call_operand.hbm [shape: f32[2,16,128], index: 4, kind: output, shape index: {}]  }
   0x1   :  { %11 = vsyncpa [#allocation4 + $0x1], 0 }
   0x2   :  { %12 = vsyncpa [#allocation7], 0 }
   0x3   :  { %13 = vsyncpa [#allocation10], 0 }
   0x4   :  { %14 = vsyncpa [#allocation5], 0 }
   0x5   :  { %16 = vsyncpa [#allocation5 + $0x1], 0  ;;  %s3494_s15 = smov 0   ;;  %s3496_s16 = smov 0  }
   0x6   :  { %s3498_s17 = smov 0   ;;  %s3500_s18 = smov 0  }
   0x7 LB: > { %s3515_s19 = sadd.s32 4294967295, %s3450_s18   ;;  %s2594_s20 = sadd.s32 4294967294, %s3450_s18   ;;  %s3450_s18 = sphi %s3500_s18, %s4095_s18   ;;  %s3446_s17 = sphi %s3498_s17, %s4094_s17   ;;  %s3442_s16 = sphi %s3496_s16, %s4093_s16   ;;  %s3438_s15 = sphi %s3494_s15, %s4092_s15  }
   0x8   : > { %p42_p0 = scmp.ne.s32.totalorder %s3442_s16, %s3438_s15  ;;  %p4073_p1 = scmp.eq.s32.totalorder %s3515_s19, 0 }
   0x9   : > { %p135_p3 = scmp.eq.s32.totalorder %s2594_s20, 1  ;;  %p2595_p5 = scmp.ge.s32.totalorder %s3450_s18, 1 }
   0xa   : > { %p3524_p4 = por %p4073_p1, %p42_p0  ;;  %p142_p7 = scmp.lt.s32.totalorder %s3450_s18, 3 }
   0xb   : > { %p3529_p6 = por %p135_p3, %p42_p0  ;;  %s3452_s24 = smov [#allocation6]  }
   0xc   : > { %s4076_s21 = scalar_select %p3524_p4, 1, 0 }
   0xd   : > { %s4077_s22 = scalar_select %p3529_p6, 1, 0 }
   0xe   : > { %p3534_p8 = pnand %p2595_p5, %p142_p7  ;;  %s154_s25 = sshll.u32 %s3452_s24, 4  ;;  %s3538_s25 = int_to_ptr.vmem [resolvable:$true] %s154_s25 }
   0xf   : > { %s3453_s27 = smov [#allocation8]   ;;  %s3262_s5 = scalar_lea.hbm %s4069_s1, 12288 }
  0x10   : > { %s4078_s23 = scalar_select %p3534_p8, 1, 0 }
  0x11   : > { %p2949_p9 = pneg %p3534_p8  ;;  %s167_s28 = sshll.u32 %s3453_s27, 4  ;;  %s3549_s28 = int_to_ptr.vmem [resolvable:$true] %s167_s28 }
  0x12   : > { %p3263_p12 = scmp.ne.s32.totalorder %s4069_s1, %s3262_s5  ;;  %p3269_p5 = scmp.lt.u32.totalorder %s3262_s5, %s4069_s1 }
  0x13   : > { %p3545_p11 = pnand %p2949_p9, %p4073_p1 }
  0x15   : > { %p3559_p13 = pneg %p3545_p11 }
  0x17   : > { %p3265_p0 = pnand %p3559_p13, %p3263_p12 }
  0x19   : > { %p3266_p3 = pneg %p3265_p0 }
  0x1b   : > { %p3271_p7 = pnand %p3269_p5, %p3266_p3 }
  0x1d   : > { %3274 = shalt.err (!%p3271_p7)
}
  0x1e   : > { %s3275_s11 = scalar_lea.vmem %s3538_s25, 12288  ;;  %p3283_p2 = scmp.lt.s32.totalorder %s3538_s25, %s3538_s25 }
  0x1f   : > { %p3276_p9 = scmp.ne.s32.totalorder %s3538_s25, %s3275_s11  ;;  %p3284_p6 = scmp.lt.s32.totalorder %s3275_s11, %s3275_s11 }
  0x21   : > { %p3278_p10 = pnand %p3276_p9, %p3559_p13  ;;  %p3285_p12 = por %p3284_p6, %p3283_p2 }
  0x23   : > { %p3279_p1 = pneg %p3278_p10 }
  0x25   : > { %p3286_p0 = pnand %p3285_p12, %p3279_p1 }
  0x27   : > { %3289 = shalt.err (!%p3286_p0)
}
  0x28   : > { %s3454_s12 = smov 768   ;;  %s3455_s13 = smov 48  }
  0x29   : > { %2952 = dma.hbm_to_vmem [thread:$0]  (!%p3545_p11), %s4069_s1, 12288, %s3538_s25, [#allocation7], %s3454_s12, %s3454_s12, %s3455_s13  }
  0x2a   : > { %s3290_s29 = scalar_lea.hbm %s4070_s2, 4096 }
  0x2b   : > { %p3291_p2 = scmp.ne.s32.totalorder %s4070_s2, %s3290_s29  ;;  %p3297_p10 = scmp.lt.u32.totalorder %s3290_s29, %s4070_s2 }
  0x2d   : > { %p3293_p1 = pnand %p3291_p2, %p3559_p13 }
  0x2f   : > { %p3294_p6 = pneg %p3293_p1 }
  0x31   : > { %p3299_p3 = pnand %p3297_p10, %p3294_p6 }
  0x33   : > { %3302 = shalt.err (!%p3299_p3)
}
  0x34   : > { %s3303_s25 = scalar_lea.vmem %s3549_s28, 4096  ;;  %p3311_p12 = scmp.lt.s32.totalorder %s3549_s28, %s3549_s28 }
  0x35   : > { %p3304_p5 = scmp.ne.s32.totalorder %s3549_s28, %s3303_s25  ;;  %p3312_p0 = scmp.lt.s32.totalorder %s3303_s25, %s3303_s25 }
  0x37   : > { %p3306_p7 = pnand %p3304_p5, %p3559_p13  ;;  %p3313_p2 = por %p3312_p0, %p3311_p12 }
  0x39   : > { %p3307_p9 = pneg %p3306_p7 }
  0x3b   : > { %p3314_p1 = pnand %p3313_p2, %p3307_p9 }
  0x3d   : > { %3317 = shalt.err (!%p3314_p1)
}
  0x3e   : > { %s3456_s9 = smov 64   ;;  %s3457_s10 = smov 4  }
  0x3f   : > { %2955 = dma.hbm_to_vmem [thread:$0]  (!%p3545_p11), %s4070_s2, 4096, %s3549_s28, [#allocation7], %s3456_s9, %s3456_s9, %s3457_s10  }
  0x40   : > { %s3458_s13 = smov [#allocation9]   ;;  %s3604_s20 = sadd.s32 1, %s3450_s18  }
  0x41   : > { %s181_s14 = sshll.u32 %s3458_s13, 4  ;;  %s3318_s29 = scalar_lea.hbm %s4071_s3, 16  ;;  %s182_s14 = int_to_ptr.vmem [resolvable:$true] %s181_s14 }
  0x42   : > { %p3319_p6 = scmp.ne.s32.totalorder %s4071_s3, %s3318_s29  ;;  %p3325_p5 = scmp.lt.u32.totalorder %s3318_s29, %s4071_s3 }
  0x44   : > { %p3321_p10 = pnand %p3319_p6, %p3559_p13 }
  0x46   : > { %p3322_p3 = pneg %p3321_p10 }
  0x48   : > { %p3327_p7 = pnand %p3325_p5, %p3322_p3 }
  0x4a   : > { %3330 = shalt.err (!%p3327_p7)
}
  0x4b   : > { %s3331_s28 = scalar_lea.vmem %s182_s14, 16  ;;  %s3338_s25 = scalar_lea.vmem %s182_s14, 32 }
  0x4c   : > { %p3332_p9 = scmp.ne.s32.totalorder %s182_s14, %s3331_s28  ;;  %p3339_p2 = scmp.lt.s32.totalorder %s182_s14, %s182_s14 }
  0x4d   : > { %p3340_p1 = scmp.lt.s32.totalorder %s3338_s25, %s3331_s28 }
  0x4e   : > { %p3334_p12 = pnand %p3332_p9, %p3559_p13 }
  0x4f   : > { %p3341_p4 = por %p3340_p1, %p3339_p2 }
  0x50   : > { %p3335_p0 = pneg %p3334_p12 }
  0x52   : > { %p3342_p8 = pnand %p3341_p4, %p3335_p0 }
  0x54   : > { %3345 = shalt.err (!%p3342_p8)
}
  0x55   : > { %2958 = dma.hbm_to_vmem [thread:$0]  (!%p3545_p11), %s4071_s3, 16, %s182_s14, [#allocation10]  }
  0x56   : > { %s26_s8 = ssub.s32 %s3450_s18, %s3604_s20  ;;  %s29_s11 = sadd.s32 1, %s3446_s17 }
  0x57   : > { %p27_p4 = scmp.eq.s32.totalorder %s26_s8, 0  ;;  %p36_p8 = scmp.ne.s32.totalorder %s3446_s17, %s3442_s16 }
  0x58   : > { %p37_p13 = scmp.eq.s32.totalorder %s3450_s18, 0  ;;  %p2970_p6 = scmp.lt.s32.totalorder %s3450_s18, 2 }
  0x59   : > { %s3632_s26 = scalar_select %p27_p4, %s3446_s17, %s29_s11  }
  0x5a   : > { %p38_p10 = por %p37_p13, %p36_p8  ;;  %p4081_p3 = scmp.eq.s32.totalorder %s3515_s19, 1 }
  0x5b   : > { %s192_s13 = sand.u32 1, %s3446_s17   ;;  %s2759_s24 = sshll.u32 %s3450_s18, 8 }
  0x5c   : > { %p3636_p5 = por %p4081_p3, %p36_p8  ;;  %s2600_s27 = sshll.u32 %s192_s13, 4 }
  0x5d   : > { %s3645_s14 = scalar_lea.hbm %s4068_s0, %s2759_s24  ;;  %s196_s5 = scalar_lea.vmem [#allocation3], %s2600_s27 }
  0x5e   : > { %s203_s6 = sshll.u32 %s196_s5, 4  ;;  %p3647_p11 = pnand %p2970_p6, %p38_p10  ;;  %s3651_s6 = int_to_ptr.vmem [resolvable:$true] %s203_s6 }
  0x5f   : > { %s3653_s28 = scalar_lea.sflag [#allocation4], %s192_s13  ;;  %s3346_s25 = scalar_lea.hbm %s3645_s14, 256 }
  0x60   : > { %p3347_p7 = scmp.ne.s32.totalorder %s3645_s14, %s3346_s25  ;;  %p3348_p9 = pneg %p3647_p11 }
  0x61   : > { %s3351_s8 = scalar_lea.hbm %s4068_s0, 512  ;;  %p3352_p2 = scmp.lt.u32.totalorder %s3645_s14, %s4068_s0 }
  0x62   : > { %p3349_p12 = pnand %p3348_p9, %p3347_p7  ;;  %p3353_p1 = scmp.lt.u32.totalorder %s3351_s8, %s3346_s25 }
  0x63   : > { %p3355_p8 = scmp.lt.u32.totalorder %s3346_s25, %s3645_s14 }
  0x64   : > { %p3350_p0 = pneg %p3349_p12  ;;  %p3354_p4 = por %p3353_p1, %p3352_p2 }
  0x66   : > { %p3356_p13 = por %p3355_p8, %p3354_p4 }
  0x68   : > { %p3357_p6 = pnand %p3356_p13, %p3350_p0 }
  0x6a   : > { %3360 = shalt.err (!%p3357_p6)
}
  0x6b   : > { %s3361_s13 = scalar_lea.vmem %s3651_s6, 256  ;;  %s3459_s27 = smov [#allocation3]  }
  0x6c   : > { %p3362_p10 = scmp.ne.s32.totalorder %s3651_s6, %s3361_s13  ;;  %s3366_s29 = sshll.u32 %s3459_s27, 4  ;;  %s3367_s29 = int_to_ptr.vmem [resolvable:$false] %s3366_s29 }
  0x6d   : > { %s3368_s30 = scalar_lea.vmem %s3367_s29, 512  ;;  %p3369_p12 = scmp.lt.s32.totalorder %s3651_s6, %s3367_s29 }
  0x6e   : > { %p3364_p3 = pnand %p3362_p10, %p3348_p9  ;;  %p3370_p2 = scmp.lt.s32.totalorder %s3368_s30, %s3361_s13 }
  0x70   : > { %p3365_p7 = pneg %p3364_p3  ;;  %p3371_p1 = por %p3370_p2, %p3369_p12 }
  0x72   : > { %p3372_p4 = pnand %p3371_p1, %p3365_p7 }
  0x74   : > { %3375 = shalt.err (!%p3372_p4)
}
  0x75   : > { %s3460_s5 = smov 128   ;;  %s3461_s25 = smov 8  }
  0x76   : > { %2962 = dma.hbm_to_vmem [thread:$0]  (!%p3647_p11), %s3645_s14, 256, %s3651_s6, %s3653_s28, %s3460_s5, %s3460_s5, %s3461_s25  }
  0x77   : > { %p4084_p9 = scmp.ne.s32.totalorder %s4078_s23, 0 }
  0x78   : > { %s3684_s9 = sand.u32 (!%p4084_p9), 1, %s3442_s16   ;;  %p4085_p0 = scmp.ne.s32.totalorder (!%p4084_p9), %s4076_s21, 0 }
  0x79   : > { %215 = sbr.rel (%p4084_p9) target bundleno = 1725 (0x6bd), region = 36  ;;  %s2604_s10 = sshll.u32 (!%p4084_p9), %s3684_s9, 4 }
  0x7a   : > { %s218_s8 = scalar_lea.sflag (!%p4084_p9), [#allocation4], %s3684_s9  ;;  %s3690_s11 = scalar_lea.vmem (!%p4084_p9), [#allocation3], %s2604_s10 }
  0x80   : > { %3421 = dma.done.wait (%p4085_p0), %s218_s8, 256  }
  0x81   : > { %3423 = vsyncadd (%p4085_p0), %s218_s8, 4294967040  ;;  %p4086_p11 = scmp.eq.s32.totalorder %s3515_s19, 0 }
  0x83   : > { %3425 = dma.done.wait (%p4086_p11), [#allocation7], 16384   ;;  %p4087_p8 = pmov %p4086_p11 }
  0x85   : > { %3427 = vsyncadd (%p4087_p8), [#allocation7], 4294950912  ;;  %p4088_p13 = pmov %p4087_p8 }
  0x86   : > { %p4089_p6 = pmov %p4087_p8 }
  0x87   : > { %3429 = dma.done.wait (%p4088_p13), [#allocation10], 16  }
  0x88   : > { %3431 = vsyncadd (%p4089_p6), [#allocation10], 4294967280  ;;  %v3462_v0 = vmov 0   ;;  %v3022_v1 = vld [vmem:[#allocation6 + $0x4] ss:$48 sps:$4 sm:$0xff]   ;;  %v260_v27 = vld [vmem:[%s3690_s11 + $0x8] sm:$0xff] }
  0x89   : > { %870 = vmatprep.mubr.bf16.mxu0 %v3462_v0  ;;  %913 = vmatprep.mubr.bf16.mxu1 %v3462_v0  ;;  %v3024_v2 = vld [vmem:[#allocation6] ss:$48 sps:$4 sm:$0xff]   ;;  %v3025_v3 = vld [vmem:[#allocation6 + $0x64] ss:$48 sps:$4 sm:$0xff]   ;;  %v3046_v10 = vld [vmem:[#allocation6 + $0xc] ss:$48 sps:$4 sm:$0xff]  }
  0x8a   : > { %838 = vmatprep.subr.bf16.mxu0 %v3022_v1  ;;  %v3027_v4 = vld [vmem:[#allocation6 + $0x60] ss:$48 sps:$4 sm:$0xff]   ;;  %v3028_v5 = vld [vmem:[#allocation6 + $0xc4] ss:$48 sps:$4 sm:$0xff]   ;;  %v3051_v11 = vld [vmem:[#allocation6 + $0x8] ss:$48 sps:$4 sm:$0xff]   ;;  %881 = vmatprep.subr.bf16.mxu1 %v3046_v10 }
  0x8b   : > { %839 = vmatpush1.bf16.msra.mxu0 %v3024_v2  ;;  %v3030_v6 = vld [vmem:[#allocation6 + $0xc0] ss:$48 sps:$4 sm:$0xff]   ;;  %v3031_v7 = vld [vmem:[#allocation6 + $0x124] ss:$48 sps:$4 sm:$0xff]   ;;  %v3052_v12 = vld [vmem:[#allocation6 + $0x6c] ss:$48 sps:$4 sm:$0xff]   ;;  %882 = vmatpush1.bf16.msra.mxu1 %v3051_v11 }
  0x8c   : > { %840 = vmatprep.subr.bf16.mxu0 %v3025_v3  ;;  %v3033_v8 = vld [vmem:[#allocation6 + $0x120] ss:$48 sps:$4 sm:$0xff]   ;;  %v3034_v9 = vld [vmem:[#allocation6 + $0x184] ss:$48 sps:$4 sm:$0xff]   ;;  %883 = vmatprep.subr.bf16.mxu1 %v3052_v12  ;;  %v3057_v15 = vld [vmem:[#allocation6 + $0x68] ss:$48 sps:$4 sm:$0xff]  }
  0x8d   : > { %v3036_v13 = vld [vmem:[#allocation6 + $0x180] ss:$48 sps:$4 sm:$0xff]   ;;  %v3037_v14 = vld [vmem:[#allocation6 + $0x1e4] ss:$48 sps:$4 sm:$0xff]   ;;  %v3058_v16 = vld [vmem:[#allocation6 + $0xcc] ss:$48 sps:$4 sm:$0xff]  }
  0x8e   : > { %v3039_v17 = vld [vmem:[#allocation6 + $0x1e0] ss:$48 sps:$4 sm:$0xff]   ;;  %v3040_v18 = vld [vmem:[#allocation6 + $0x244] ss:$48 sps:$4 sm:$0xff]   ;;  %v3063_v19 = vld [vmem:[#allocation6 + $0xc8] ss:$48 sps:$4 sm:$0xff]  }
  0x8f   : > { %841 = vmatpush1.bf16.msra.mxu0 %v3027_v4  ;;  %884 = vmatpush1.bf16.msra.mxu1 %v3057_v15  ;;  %v3064_v20 = vld [vmem:[#allocation6 + $0x12c] ss:$48 sps:$4 sm:$0xff]   ;;  %v3042_v21 = vld [vmem:[#allocation6 + $0x240] ss:$48 sps:$4 sm:$0xff]   ;;  %v3069_v22 = vld [vmem:[#allocation6 + $0x128] ss:$48 sps:$4 sm:$0xff]  }
  0x90   : > { %842 = vmatprep.subr.bf16.mxu0 %v3028_v5  ;;  %885 = vmatprep.subr.bf16.mxu1 %v3058_v16  ;;  %v3043_v23 = vld [vmem:[#allocation6 + $0x2a4] ss:$48 sps:$4 sm:$0xff]   ;;  %v3070_v24 = vld [vmem:[#allocation6 + $0x18c] ss:$48 sps:$4 sm:$0xff]   ;;  %v3045_v25 = vld [vmem:[#allocation6 + $0x2a0] ss:$48 sps:$4 sm:$0xff]  }
  0x91   : > { %v259_v26 = vld [vmem:[%s3690_s11] sm:$0xff]  ;;  %v3075_v29 = vld [vmem:[#allocation6 + $0x188] ss:$48 sps:$4 sm:$0xff]   ;;  %v3076_v30 = vld [vmem:[#allocation6 + $0x1ec] ss:$48 sps:$4 sm:$0xff]   ;;  %vm3464_vm0 = vmmov 0  }
  0x92   : > { %v3050_v28 = vld [vmem:[#allocation6 + $0x14] ss:$48 sps:$4 sm:$0xff]   ;;  %v3708_v31 = vpack.c.bf16 %v260_v27, %v259_v26  ;;  %v3048_v32 = vld [vmem:[#allocation6 + $0x10] ss:$48 sps:$4 sm:$0xff]   ;;  %v3081_v33 = vld [vmem:[#allocation6 + $0x1e8] ss:$48 sps:$4 sm:$0xff]  }
  0x93   : > { %843 = vmatpush1.bf16.msra.mxu0 %v3030_v6  ;;  %886 = vmatpush1.bf16.msra.mxu1 %v3063_v19  ;;  %v3056_v34 = vld [vmem:[#allocation6 + $0x74] ss:$48 sps:$4 sm:$0xff]   ;;  %v3082_v35 = vld [vmem:[#allocation6 + $0x24c] ss:$48 sps:$4 sm:$0xff]   ;;  %v3054_v36 = vld [vmem:[#allocation6 + $0x70] ss:$48 sps:$4 sm:$0xff]  }
  0x94   : > { %844 = vmatprep.subr.bf16.mxu0 %v3031_v7  ;;  %887 = vmatprep.subr.bf16.mxu1 %v3064_v20  ;;  %v3087_v37 = vld [vmem:[#allocation6 + $0x248] ss:$48 sps:$4 sm:$0xff]   ;;  %v3062_v38 = vld [vmem:[#allocation6 + $0xd4] ss:$48 sps:$4 sm:$0xff]   ;;  %v3088_v39 = vld [vmem:[#allocation6 + $0x2ac] ss:$48 sps:$4 sm:$0xff]  }
  0x95   : > { %v3060_v40 = vld [vmem:[#allocation6 + $0xd0] ss:$48 sps:$4 sm:$0xff]   ;;  %v3093_v41 = vld [vmem:[#allocation6 + $0x2a8] ss:$48 sps:$4 sm:$0xff]   ;;  %v3068_v42 = vld [vmem:[#allocation6 + $0x134] ss:$48 sps:$4 sm:$0xff]  }
  0x96   : > { %v3096_v43 = vld [vmem:[#allocation6 + $0x1c] ss:$48 sps:$4 sm:$0xff]   ;;  %v3066_v44 = vld [vmem:[#allocation6 + $0x130] ss:$48 sps:$4 sm:$0xff]   ;;  %v3074_v45 = vld [vmem:[#allocation6 + $0x194] ss:$48 sps:$4 sm:$0xff]  }
  0x97   : > { %845 = vmatpush1.bf16.msra.mxu0 %v3033_v8  ;;  %888 = vmatpush1.bf16.msra.mxu1 %v3069_v22  ;;  %v3094_v46 = vld [vmem:[#allocation6 + $0x18] ss:$48 sps:$4 sm:$0xff]   ;;  %v3099_v47 = vld [vmem:[#allocation6 + $0x7c] ss:$48 sps:$4 sm:$0xff]   ;;  %v3072_v48 = vld [vmem:[#allocation6 + $0x190] ss:$48 sps:$4 sm:$0xff]  }
  0x98   : > { %846 = vmatprep.subr.bf16.mxu0 %v3034_v9  ;;  %889 = vmatprep.subr.bf16.mxu1 %v3070_v24  ;;  %v3097_v49 = vld [vmem:[#allocation6 + $0x78] ss:$48 sps:$4 sm:$0xff]   ;;  %v3080_v50 = vld [vmem:[#allocation6 + $0x1f4] ss:$48 sps:$4 sm:$0xff]   ;;  %v3102_v51 = vld [vmem:[#allocation6 + $0xdc] ss:$48 sps:$4 sm:$0xff]  }
  0x99   : > { %v3078_v52 = vld [vmem:[#allocation6 + $0x1f0] ss:$48 sps:$4 sm:$0xff]   ;;  %v3100_v53 = vld [vmem:[#allocation6 + $0xd8] ss:$48 sps:$4 sm:$0xff]   ;;  %v3086_v54 = vld [vmem:[#allocation6 + $0x254] ss:$48 sps:$4 sm:$0xff]  }
  0x9a   : > { %v3105_v55 = vld [vmem:[#allocation6 + $0x13c] ss:$48 sps:$4 sm:$0xff]   ;;  %v3084_v56 = vld [vmem:[#allocation6 + $0x250] ss:$48 sps:$4 sm:$0xff]   ;;  %v3103_v57 = vld [vmem:[#allocation6 + $0x138] ss:$48 sps:$4 sm:$0xff]  }
  0x9b   : > { %847 = vmatpush1.bf16.msra.mxu0 %v3036_v13  ;;  %890 = vmatpush1.bf16.msra.mxu1 %v3075_v29  ;;  %v3092_v58 = vld [vmem:[#allocation6 + $0x2b4] ss:$48 sps:$4 sm:$0xff]   ;;  %v3108_v59 = vld [vmem:[#allocation6 + $0x19c] ss:$48 sps:$4 sm:$0xff]   ;;  %v3090_v60 = vld [vmem:[#allocation6 + $0x2b0] ss:$48 sps:$4 sm:$0xff]  }
  0x9c   : > { %848 = vmatprep.subr.bf16.mxu0 %v3037_v14  ;;  %891 = vmatprep.subr.bf16.mxu1 %v3076_v30  ;;  %v3106_v61 = vld [vmem:[#allocation6 + $0x198] ss:$48 sps:$4 sm:$0xff]   ;;  %v3111_v62 = vld [vmem:[#allocation6 + $0x1fc] ss:$48 sps:$4 sm:$0xff]   ;;  %v3120_v5 = vld [vmem:[#allocation6 + $0x24] ss:$48 sps:$4 sm:$0xff]  }
  0x9d   : > { %v3109_v63 = vld [vmem:[#allocation6 + $0x1f8] ss:$48 sps:$4 sm:$0xff]   ;;  %v3114_v1 = vld [vmem:[#allocation6 + $0x25c] ss:$48 sps:$4 sm:$0xff]   ;;  %v3118_v6 = vld [vmem:[#allocation6 + $0x20] ss:$48 sps:$4 sm:$0xff]  }
  0x9e   : > { %v3112_v2 = vld [vmem:[#allocation6 + $0x258] ss:$48 sps:$4 sm:$0xff]   ;;  %v3117_v3 = vld [vmem:[#allocation6 + $0x2bc] ss:$48 sps:$4 sm:$0xff]   ;;  %v3123_v7 = vld [vmem:[#allocation6 + $0x84] ss:$48 sps:$4 sm:$0xff]  }
  0x9f   : > { %849 = vmatpush1.bf16.msra.mxu0 %v3039_v17  ;;  %892 = vmatpush1.bf16.msra.mxu1 %v3081_v33  ;;  %v3115_v4 = vld [vmem:[#allocation6 + $0x2b8] ss:$48 sps:$4 sm:$0xff]   ;;  %v3121_v8 = vld [vmem:[#allocation6 + $0x80] ss:$48 sps:$4 sm:$0xff]   ;;  %v3126_v10 = vld [vmem:[#allocation6 + $0xe4] ss:$48 sps:$4 sm:$0xff]  }
  0xa0   : > { %850 = vmatprep.subr.bf16.mxu0 %v3040_v18  ;;  %893 = vmatprep.subr.bf16.mxu1 %v3082_v35  ;;  %v3124_v9 = vld [vmem:[#allocation6 + $0xe0] ss:$48 sps:$4 sm:$0xff]   ;;  %v3129_v11 = vld [vmem:[#allocation6 + $0x144] ss:$48 sps:$4 sm:$0xff]   ;;  %v3463_v20 = vmov 0.0   ;;  %vm1101_vm1 = vcmask 523264  }
  0xa1   : > { %v3127_v12 = vld [vmem:[#allocation6 + $0x140] ss:$48 sps:$4 sm:$0xff]   ;;  %v3132_v13 = vld [vmem:[#allocation6 + $0x1a4] ss:$48 sps:$4 sm:$0xff]   ;;  %s3465_s21 = smov 64   ;;  %vm1149_vm2 = vcmask 130048  }
  0xa2   : > { %v3130_v14 = vld [vmem:[#allocation6 + $0x1a0] ss:$48 sps:$4 sm:$0xff]   ;;  %v3138_v16 = vld [vmem:[#allocation6 + $0x264] ss:$48 sps:$4 sm:$0xff]   ;;  %vm1351_vm3 = vcmask 1048064   ;;  %s257_s23 = scalar_lea.vmem [#allocation11], %s2604_s10 }
  0xa3   : > { %851 = vmatpush1.bf16.msra.mxu0 %v3042_v21  ;;  %894 = vmatpush1.bf16.msra.mxu1 %v3087_v37  ;;  %v3133_v15 = vld [vmem:[#allocation6 + $0x200] ss:$48 sps:$4 sm:$0xff]   ;;  %v3141_v18 = vld [vmem:[#allocation6 + $0x2c4] ss:$48 sps:$4 sm:$0xff]   ;;  %s2492_s14 = sshll.u32 %s257_s23, 4  ;;  %s2760_s6 = sshll.u32 %s3515_s19, 8  ;;  %s4019_s14 = int_to_ptr.vmem [resolvable:$true] %s2492_s14 }
  0xa4   : > { %852 = vmatprep.subr.bf16.mxu0 %v3043_v23  ;;  %895 = vmatprep.subr.bf16.mxu1 %v3088_v39  ;;  %v3136_v17 = vld [vmem:[#allocation6 + $0x260] ss:$48 sps:$4 sm:$0xff]   ;;  %s4024_s24 = scalar_lea.hbm %s4072_s4, %s2760_s6  ;;  %s2479_s13 = scalar_lea.sflag [#allocation5], %s3684_s9 }
  0xa5   : > { %v3139_v19 = vld [vmem:[#allocation6 + $0x2c0] ss:$48 sps:$4 sm:$0xff]   ;;  %s3376_s27 = scalar_lea.vmem %s4019_s14, 256  ;;  %s3466_s19 = smov [#allocation11]  }
  0xa6   : > { %p3377_p10 = scmp.ne.s32.totalorder %s4019_s14, %s3376_s27  ;;  %s3380_s29 = sshll.u32 %s3466_s19, 4  ;;  %s3381_s29 = int_to_ptr.vmem [resolvable:$false] %s3380_s29 }
  0xa7   : > { %853 = vmatpush1.bf16.msra.mxu0 %v3045_v25  ;;  %896 = vmatpush1.bf16.msra.mxu1 %v3093_v41  ;;  %s3382_s30 = scalar_lea.vmem %s3381_s29, 512  ;;  %p3383_p12 = scmp.lt.s32.totalorder %s4019_s14, %s3381_s29 }
  0xa8   : > { %924 = vmatprep.subr.bf16.mxu0 %v3050_v28  ;;  %967 = vmatprep.subr.bf16.mxu1 %v3096_v43  ;;  %p3378_p3 = pnand %p3377_p10, %p3636_p5  ;;  %p3384_p2 = scmp.lt.s32.totalorder %s3382_s30, %s3376_s27 }
  0xaa   : > { %871 = vmatmul.mubr.bf16.vlgmr.msra.gmra.mrb[0].mxu0 %v3708_v31  ;;  %914 = vmatmul.mubr.bf16.vlgmr.msra.gmra.mrb[0].mxu1 %v3708_v31  ;;  %p3379_p7 = pneg %p3378_p3  ;;  %p3385_p1 = por %p3384_p2, %p3383_p12 }
  0xab   : > { %925 = vmatpush1.bf16.msra.mxu0 %v3048_v32  ;;  %956 = vmatprep.mubr.bf16.mxu0 %v3462_v0 }
  0xac   : > { %926 = vmatprep.subr.bf16.mxu0 %v3056_v34  ;;  %968 = vmatpush1.bf16.msra.mxu1 %v3094_v46  ;;  %p3386_p4 = pnand %p3385_p1, %p3379_p7 }
  0xad   : > { %969 = vmatprep.subr.bf16.mxu1 %v3099_v47  ;;  %999 = vmatprep.mubr.bf16.mxu1 %v3462_v0 }
  0xaf   : > { %927 = vmatpush1.bf16.msra.mxu0 %v3054_v36 }
  0xb0   : > { %928 = vmatprep.subr.bf16.mxu0 %v3062_v38  ;;  %970 = vmatpush1.bf16.msra.mxu1 %v3097_v49 }
  0xb1   : > { %971 = vmatprep.subr.bf16.mxu1 %v3102_v51 }
  0xb3   : > { %929 = vmatpush1.bf16.msra.mxu0 %v3060_v40 }
  0xb4   : > { %930 = vmatprep.subr.bf16.mxu0 %v3068_v42  ;;  %972 = vmatpush1.bf16.msra.mxu1 %v3100_v53 }
  0xb5   : > { %973 = vmatprep.subr.bf16.mxu1 %v3105_v55 }
  0xb7   : > { %931 = vmatpush1.bf16.msra.mxu0 %v3066_v44 }
  0xb8   : > { %932 = vmatprep.subr.bf16.mxu0 %v3074_v45  ;;  %974 = vmatpush1.bf16.msra.mxu1 %v3103_v57 }
  0xb9   : > { %975 = vmatprep.subr.bf16.mxu1 %v3108_v59 }
  0xbb   : > { %933 = vmatpush1.bf16.msra.mxu0 %v3072_v48 }
  0xbc   : > { %934 = vmatprep.subr.bf16.mxu0 %v3080_v50  ;;  %976 = vmatpush1.bf16.msra.mxu1 %v3106_v61  ;;  %v3142_v61 = vld [vmem:[#allocation6 + $0x28] ss:$48 sps:$4 sm:$0xff]  }
  0xbd   : > { %977 = vmatprep.subr.bf16.mxu1 %v3111_v62  ;;  %v3144_v62 = vld [vmem:[#allocation6 + $0x2c] ss:$48 sps:$4 sm:$0xff]  }
  0xbf   : > { %935 = vmatpush1.bf16.msra.mxu0 %v3078_v52 }
  0xc0   : > { %936 = vmatprep.subr.bf16.mxu0 %v3086_v54  ;;  %978 = vmatpush1.bf16.msra.mxu1 %v3109_v63  ;;  %v3147_v63 = vld [vmem:[#allocation6 + $0x8c] ss:$48 sps:$4 sm:$0xff]  }
  0xc1   : > { %979 = vmatprep.subr.bf16.mxu1 %v3114_v1  ;;  %v3145_v1 = vld [vmem:[#allocation6 + $0x88] ss:$48 sps:$4 sm:$0xff]  }
  0xc3   : > { %937 = vmatpush1.bf16.msra.mxu0 %v3084_v56 }
  0xc4   : > { %938 = vmatprep.subr.bf16.mxu0 %v3092_v58  ;;  %980 = vmatpush1.bf16.msra.mxu1 %v3112_v2  ;;  %v3150_v2 = vld [vmem:[#allocation6 + $0xec] ss:$48 sps:$4 sm:$0xff]  }
  0xc5   : > { %981 = vmatprep.subr.bf16.mxu1 %v3117_v3  ;;  %v3148_v3 = vld [vmem:[#allocation6 + $0xe8] ss:$48 sps:$4 sm:$0xff]  }
  0xc7   : > { %939 = vmatpush1.bf16.msra.mxu0 %v3090_v60 }
  0xc8   : > { %982 = vmatpush1.bf16.msra.mxu1 %v3115_v4  ;;  %1010 = vmatprep.subr.bf16.mxu0 %v3120_v5  ;;  %v3153_v4 = vld [vmem:[#allocation6 + $0x14c] ss:$48 sps:$4 sm:$0xff]   ;;  %v3151_v5 = vld [vmem:[#allocation6 + $0x148] ss:$48 sps:$4 sm:$0xff]  }
  0xc9   : > { %1053 = vmatprep.subr.bf16.mxu1 %v3144_v62 }
  0xca   : > { %957 = vmatmul.mubr.bf16.vlgmr.msra.gmra.mrb[4].mxu0 %v3708_v31 }
  0xcb   : > { %1042 = vmatprep.mubr.bf16.mxu0 %v3462_v0  ;;  %1000 = vmatmul.mubr.bf16.vlgmr.msra.gmra.mrb[4].mxu1 %v3708_v31 }
  0xcc   : > { %1085 = vmatprep.mubr.bf16.mxu1 %v3462_v0  ;;  %1011 = vmatpush1.bf16.msra.mxu0 %v3118_v6  ;;  %v3135_v0 = vld [vmem:[#allocation6 + $0x204] ss:$48 sps:$4 sm:$0xff]   ;;  %v3156_v6 = vld [vmem:[#allocation6 + $0x1ac] ss:$48 sps:$4 sm:$0xff]  }
  0xcd   : > { %1012 = vmatprep.subr.bf16.mxu0 %v3123_v7  ;;  %1054 = vmatpush1.bf16.msra.mxu1 %v3142_v61  ;;  %v3154_v7 = vld [vmem:[#allocation6 + $0x1a8] ss:$48 sps:$4 sm:$0xff]  }
  0xce   : > { %1055 = vmatprep.subr.bf16.mxu1 %v3147_v63 }
  0xd0   : > { %1013 = vmatpush1.bf16.msra.mxu0 %v3121_v8  ;;  %v3159_v8 = vld [vmem:[#allocation6 + $0x20c] ss:$48 sps:$4 sm:$0xff]  }
  0xd1   : > { %1014 = vmatprep.subr.bf16.mxu0 %v3126_v10  ;;  %1056 = vmatpush1.bf16.msra.mxu1 %v3145_v1  ;;  %v3157_v10 = vld [vmem:[#allocation6 + $0x208] ss:$48 sps:$4 sm:$0xff]  }
  0xd2   : > { %1057 = vmatprep.subr.bf16.mxu1 %v3150_v2 }
  0xd4   : > { %1015 = vmatpush1.bf16.msra.mxu0 %v3124_v9 }
  0xd5   : > { %1016 = vmatprep.subr.bf16.mxu0 %v3129_v11  ;;  %1058 = vmatpush1.bf16.msra.mxu1 %v3148_v3 }
  0xd6   : > { %1059 = vmatprep.subr.bf16.mxu1 %v3153_v4 }
  0xd8   : > { %1017 = vmatpush1.bf16.msra.mxu0 %v3127_v12  ;;  %v3162_v12 = vld [vmem:[#allocation6 + $0x26c] ss:$48 sps:$4 sm:$0xff]  }
  0xd9   : > { %1018 = vmatprep.subr.bf16.mxu0 %v3132_v13  ;;  %1060 = vmatpush1.bf16.msra.mxu1 %v3151_v5  ;;  %v3160_v13 = vld [vmem:[#allocation6 + $0x268] ss:$48 sps:$4 sm:$0xff]  }
  0xda   : > { %1061 = vmatprep.subr.bf16.mxu1 %v3156_v6 }
  0xdc   : > { %1019 = vmatpush1.bf16.msra.mxu0 %v3130_v14  ;;  %v3165_v14 = vld [vmem:[#allocation6 + $0x2cc] ss:$48 sps:$4 sm:$0xff]  }
  0xdd   : > { %1020 = vmatprep.subr.bf16.mxu0 %v3135_v0  ;;  %1062 = vmatpush1.bf16.msra.mxu1 %v3154_v7 }
  0xde   : > { %1063 = vmatprep.subr.bf16.mxu1 %v3159_v8 }
  0xe0   : > { %1021 = vmatpush1.bf16.msra.mxu0 %v3133_v15  ;;  %v3163_v15 = vld [vmem:[#allocation6 + $0x2c8] ss:$48 sps:$4 sm:$0xff]  }
  0xe1   : > { %1022 = vmatprep.subr.bf16.mxu0 %v3138_v16  ;;  %1064 = vmatpush1.bf16.msra.mxu1 %v3157_v10 }
  0xe2   : > { %1065 = vmatprep.subr.bf16.mxu1 %v3162_v12 }
  0xe4   : > { %1023 = vmatpush1.bf16.msra.mxu0 %v3136_v17 }
  0xe5   : > { %1024 = vmatprep.subr.bf16.mxu0 %v3141_v18  ;;  %1066 = vmatpush1.bf16.msra.mxu1 %v3160_v13 }
  0xe6   : > { %1067 = vmatprep.subr.bf16.mxu1 %v3165_v14 }
  0xe8   : > { %1025 = vmatpush1.bf16.msra.mxu0 %v3139_v19 }
  0xe9   : > { %2837 = vmatprep.subr.bf16.mxu0 %v3463_v20  ;;  %1068 = vmatpush1.bf16.msra.mxu1 %v3163_v15 }
  0xea   : > { %2843 = vmatprep.subr.bf16.mxu1 %v3463_v20 }
  0xeb   : > { %1043 = vmatmul.mubr.bf16.vlgmr.msra.gmra.mrb[8].mxu0 %v3708_v31 }
  0xec   : > { %2839 = vmatprep.mubr.msk.bf16.mxu0 %vm3464_vm0, %v3463_v20  ;;  %1086 = vmatmul.mubr.bf16.vlgmr.msra.gmra.mrb[8].mxu1 %v3708_v31 }
  0xed   : > { %2845 = vmatprep.mubr.msk.bf16.mxu1 %vm3464_vm0, %v3463_v20 }
 0x17d   : > { %v872_v21 = vpop.f32.mrb[0].mxu0  ;;  %v915_v32 = vpop.f32.mrb[0].mxu1 }
 0x17e   : > { %v1096_v22 = vmul.f32 0.125, %v872_v21  ;;  %v874_v23 = vpop.f32.mrb[1].mxu0  ;;  %v1609_v33 = vmul.f32 0.125, %v915_v32  ;;  %v917_v34 = vpop.f32.mrb[1].mxu1 }
 0x17f   : > { %v876_v24 = vpop.f32.mrb[2].mxu0  ;;  %v1354_v27 = vmul.f32 0.125, %v874_v23  ;;  %v1864_v35 = vmul.f32 0.125, %v917_v34  ;;  %v919_v36 = vpop.f32.mrb[2].mxu1 }
 0x180   : > { %v1097_v25 = vmul.f32 0.125, %v876_v24  ;;  %v878_v26 = vpop.f32.mrb[3].mxu0  ;;  %v1610_v37 = vmul.f32 0.125, %v919_v36  ;;  %v921_v38 = vpop.f32.mrb[3].mxu1 }
 0x181   : > { %v1355_v28 = vmul.f32 0.125, %v878_v26  ;;  %v1865_v39 = vmul.f32 0.125, %v921_v38 }
 0x182   : > { %v1098_v29 = vpack.c.bf16 %v1097_v25, %v1096_v22  ;;  %v3724_v40 = vpack.c.bf16 %v1610_v37, %v1609_v33 }
 0x183   : > { %v3722_v30 = vpack.c.bf16 %v1355_v28, %v1354_v27  ;;  %v3726_v41 = vpack.c.bf16 %v1865_v39, %v1864_v35 }
 0x19d   : > { %v958_v42 = vpop.f32.mrb[4].mxu0 }
 0x19e   : > { %v960_v43 = vpop.f32.mrb[5].mxu0  ;;  %v1001_v49 = vpop.f32.mrb[4].mxu1 }
 0x19f   : > { %v962_v44 = vpop.f32.mrb[6].mxu0  ;;  %v1003_v50 = vpop.f32.mrb[5].mxu1 }
 0x1a0   : > { %v1099_v45 = vpack.c.bf16 %v962_v44, %v958_v42  ;;  %v964_v46 = vpop.f32.mrb[7].mxu0  ;;  %v1005_v51 = vpop.f32.mrb[6].mxu1 }
 0x1a1   : > { %v1357_v47 = vpack.c.bf16 %v964_v46, %v960_v43  ;;  %v3740_v52 = vpack.c.bf16 %v1005_v51, %v1001_v49  ;;  %v1007_v53 = vpop.f32.mrb[7].mxu1 }
 0x1a2   : > { %v1106_v48 = vsel %vm1101_vm1, %v1099_v45, 0  ;;  %1223 = vrot.lane.b32.xlu0 %v1099_v45, %s3465_s21  ;;  %v3742_v54 = vpack.c.bf16 %v1007_v53, %v1003_v50 }
 0x1a3   : > { %2838 = vmatpush3.bf16.xpose.msra.mxu0 %v1106_v48  ;;  %1479 = vrot.lane.b32.xlu1 %v1357_v47, %s3465_s21  ;;  %v1363_v16 = vsel %vm1101_vm1, %v1357_v47, 0  ;;  %v1618_v31 = vsel %vm1101_vm1, %v3740_v52, 0 }
 0x1a4   : > { %2849 = vmatprep.subr.bf16.mxu0 %v3463_v20  ;;  %v1873_v24 = vsel %vm1101_vm1, %v3742_v54, 0 }
 0x1a6   : > { %1220 = vrot.lane.b32.xlu0 %v1098_v29, %s3465_s21 }
 0x1a7   : > { %1476 = vrot.lane.b32.xlu1 %v3722_v30, %s3465_s21 }
 0x1aa   : > { %2840 = vmatmul.mubr.msk.bf16.vlgmr.msra.gmra.mrb[12].mxu0 %vm1101_vm1, %v1098_v29  ;;  %1734 = vrot.lane.b32.xlu0 %v3740_v52, %s3465_s21 }
 0x1ab   : > { %1731 = vrot.lane.b32.xlu1 %v3724_v40, %s3465_s21  ;;  %2851 = vmatprep.mubr.msk.bf16.mxu0 %vm3464_vm0, %v3463_v20 }
 0x1ae   : > { %1989 = vrot.lane.b32.xlu0 %v3742_v54, %s3465_s21 }
 0x1af   : > { %1986 = vrot.lane.b32.xlu1 %v3726_v41, %s3465_s21 }
 0x1be   : > { %v1044_v55 = vpop.f32.mrb[8].mxu0 }
 0x1bf   : > { %v1046_v56 = vpop.f32.mrb[9].mxu0 }
 0x1c0   : > { %v1048_v57 = vpop.f32.mrb[10].mxu0 }
 0x1c1   : > { %v3750_v58 = vpack.c.bf16 %v1048_v57, %v1044_v55  ;;  %v1050_v59 = vpop.f32.mrb[11].mxu0 }
 0x1c2   : > { %v3752_v60 = vpack.c.bf16 %v1050_v59, %v1046_v56 }
 0x1c3   : > { %2844 = vmatpush3.bf16.msra.mxu1 %v3750_v58 }
 0x1c4   : > { %2855 = vmatprep.subr.bf16.mxu1 %v3463_v20 }
 0x214   : > { %v1224_v9 = vpop.permute.xlu0 %1223 }
 0x215   : > { %v1229_v11 = vsel %vm1101_vm1, %v1224_v9, 0  ;;  %v1480_v17 = vpop.permute.xlu1 %1479 }
 0x216   : > { %2850 = vmatpush3.bf16.xpose.msra.mxu0 %v1229_v11  ;;  %v1485_v18 = vsel %vm1101_vm1, %v1480_v17, 0 }
 0x217   : > { %2861 = vmatprep.subr.bf16.mxu0 %v3463_v20 }
 0x218   : > { %v1221_v0 = vpop.permute.xlu0 %1220 }
 0x219   : > { %v1477_v19 = vpop.permute.xlu1 %1476 }
 0x21c   : > { %v1735_v21 = vpop.permute.xlu0 %1734 }
 0x21d   : > { %2852 = vmatmul.mubr.msk.bf16.vlgmr.msra.gmra.mrb[16].mxu0 %vm1101_vm1, %v1221_v0  ;;  %v1740_v22 = vsel %vm1101_vm1, %v1735_v21, 0  ;;  %v1732_v23 = vpop.permute.xlu1 %1731 }
 0x21e   : > { %2862 = vmatpush3.bf16.xpose.msra.mxu0 %v1363_v16  ;;  %2863 = vmatprep.mubr.msk.bf16.mxu0 %vm3464_vm0, %v3463_v20 }
 0x21f   : > { %2873 = vmatprep.subr.bf16.mxu0 %v3463_v20 }
 0x220   : > { %v1990_v25 = vpop.permute.xlu0 %1989 }
 0x221   : > { %v1995_v26 = vsel %vm1101_vm1, %v1990_v25, 0  ;;  %v1987_v27 = vpop.permute.xlu1 %1986  ;;  %v1087_v25 = vpop.f32.mrb[8].mxu1 }
 0x225   : > { %2864 = vmatmul.mubr.msk.bf16.vlgmr.msra.gmra.mrb[20].mxu0 %vm1101_vm1, %v3722_v30 }
 0x226   : > { %2874 = vmatpush3.bf16.xpose.msra.mxu0 %v1485_v18  ;;  %2875 = vmatprep.mubr.msk.bf16.mxu0 %vm3464_vm0, %v3463_v20 }
 0x227   : > { %2885 = vmatprep.subr.bf16.mxu0 %v3463_v20 }
 0x22d   : > { %2876 = vmatmul.mubr.msk.bf16.vlgmr.msra.gmra.mrb[24].mxu0 %vm1101_vm1, %v1477_v19 }
 0x22e   : > { %2886 = vmatpush3.bf16.xpose.msra.mxu0 %v1618_v31  ;;  %2887 = vmatprep.mubr.msk.bf16.mxu0 %vm3464_vm0, %v3463_v20 }
 0x22f   : > { %2897 = vmatprep.subr.bf16.mxu0 %v3463_v20 }
 0x235   : > { %2888 = vmatmul.mubr.msk.bf16.vlgmr.msra.gmra.mrb[28].mxu0 %vm1101_vm1, %v3724_v40 }
 0x236   : > { %2898 = vmatpush3.bf16.xpose.msra.mxu0 %v1740_v22  ;;  %2899 = vmatprep.mubr.msk.bf16.mxu0 %vm3464_vm0, %v3463_v20 }
 0x237   : > { %2909 = vmatprep.subr.bf16.mxu0 %v3463_v20 }
 0x23d   : > { %2900 = vmatmul.mubr.msk.bf16.vlgmr.msra.gmra.mrb[32].mxu0 %vm1101_vm1, %v1732_v23 }
 0x23e   : > { %2910 = vmatpush3.bf16.xpose.msra.mxu0 %v1873_v24  ;;  %2911 = vmatprep.mubr.msk.bf16.mxu0 %vm3464_vm0, %v3463_v20 }
 0x23f   : > { %2921 = vmatprep.subr.bf16.mxu0 %v3463_v20 }
 0x245   : > { %2912 = vmatmul.mubr.msk.bf16.vlgmr.msra.gmra.mrb[36].mxu0 %vm1101_vm1, %v3726_v41 }
 0x246   : > { %2922 = vmatpush3.bf16.xpose.msra.mxu0 %v1995_v26  ;;  %2923 = vmatprep.mubr.msk.bf16.mxu0 %vm3464_vm0, %v3463_v20  ;;  %v1089_v26 = vpop.f32.mrb[9].mxu1 }
 0x24d   : > { %2924 = vmatmul.mubr.msk.bf16.vlgmr.msra.gmra.mrb[40].mxu0 %vm1101_vm1, %v1987_v27  ;;  %v1091_v27 = vpop.f32.mrb[10].mxu1 }
 0x27d   : > { %v1142_v28 = vpop.f32.mrb[12].mxu0 }
 0x27e   : > { %v2841_v29 = vpop.f32.mrb[13].mxu0  ;;  %v1150_v30 = vsel %vm1149_vm2, %v1142_v28, -inf }
 0x27f   : > { %1151 = vmax.xlane.f32.xlu0 %v1150_v30  ;;  %v1145_v32 = vpop.f32.mrb[14].mxu0  ;;  %v1093_v29 = vpop.f32.mrb[11].mxu1 }
 0x280   : > { %v2842_v33 = vpop.f32.mrb[15].mxu0  ;;  %v1153_v34 = vsel %vm1149_vm2, %v1145_v32, -inf  ;;  %v3867_v30 = vpack.c.bf16 %v1093_v29, %v1089_v26 }
 0x281   : > { %1154 = vmax.xlane.f32.xlu1 %v1153_v34 }
 0x2f0   : > { %v3799_v35 = vpop.f32.mrb[16].mxu0 }
 0x2f1   : > { %v2853_v36 = vpop.f32.mrb[17].mxu0  ;;  %v1272_v37 = vsel %vm1149_vm2, %v3799_v35, -inf }
 0x2f2   : > { %1273 = vmax.xlane.f32.xlu0 %v1272_v37  ;;  %v3803_v38 = vpop.f32.mrb[18].mxu0 }
 0x2f3   : > { %v2854_v39 = vpop.f32.mrb[19].mxu0  ;;  %v1275_v40 = vsel %vm1149_vm2, %v3803_v38, -inf }
 0x2f6   : > { %1276 = vmax.xlane.f32.xlu0 %v1275_v40 }
 0x2f8   : > { %v3807_v41 = vpop.f32.mrb[20].mxu0 }
 0x2f9   : > { %v2865_v42 = vpop.f32.mrb[21].mxu0  ;;  %v1406_v43 = vsel %vm1149_vm2, %v3807_v41, -inf }
 0x2fa   : > { %1407 = vmax.xlane.f32.xlu1 %v1406_v43  ;;  %v3811_v44 = vpop.f32.mrb[22].mxu0 }
 0x2fb   : > { %v2866_v45 = vpop.f32.mrb[23].mxu0  ;;  %v1409_v46 = vsel %vm1149_vm2, %v3811_v44, -inf }
 0x2fc   : > { %1410 = vmax.xlane.f32.xlu0 %v1409_v46 }
 0x300   : > { %v3815_v47 = vpop.f32.mrb[24].mxu0 }
 0x301   : > { %v2877_v48 = vpop.f32.mrb[25].mxu0  ;;  %v1528_v49 = vsel %vm1149_vm2, %v3815_v47, -inf }
 0x302   : > { %1529 = vmax.xlane.f32.xlu1 %v1528_v49  ;;  %v3819_v50 = vpop.f32.mrb[26].mxu0 }
 0x303   : > { %v2878_v51 = vpop.f32.mrb[27].mxu0  ;;  %v1531_v52 = vsel %vm1149_vm2, %v3819_v50, -inf }
 0x304   : > { %1532 = vmax.xlane.f32.xlu0 %v1531_v52 }
 0x308   : > { %v3823_v53 = vpop.f32.mrb[28].mxu0 }
 0x309   : > { %v2889_v54 = vpop.f32.mrb[29].mxu0  ;;  %v1661_v55 = vsel %vm1149_vm2, %v3823_v53, -inf }
 0x30a   : > { %1662 = vmax.xlane.f32.xlu1 %v1661_v55  ;;  %v3827_v56 = vpop.f32.mrb[30].mxu0 }
 0x30b   : > { %v2890_v57 = vpop.f32.mrb[31].mxu0  ;;  %v1664_v59 = vsel %vm1149_vm2, %v3827_v56, -inf }
 0x30c   : > { %1665 = vmax.xlane.f32.xlu0 %v1664_v59  ;;  %v1152_v61 = vpop.xlane.xlu0 %1151 }
 0x30d   : > { %v1156_v63 = vsub.f32 %v1142_v28, %v1152_v61  ;;  %v3865_v28 = vpack.c.bf16 %v1091_v27, %v1087_v25 }
 0x30e   : > { %v1155_v62 = vpop.xlane.xlu1 %1154 }
 0x30f   : > { %v1157_v4 = vsub.f32 %v1145_v32, %v1155_v62  ;;  %v1158_v8 = vmul.f32 1.442695, %v1156_v63 }
 0x310   : > { %v3831_v1 = vpop.f32.mrb[32].mxu0 }
 0x311   : > { %v2901_v2 = vpop.f32.mrb[33].mxu0  ;;  %v1783_v3 = vsel %vm1149_vm2, %v3831_v1, -inf  ;;  %v1160_v9 = vmul.f32 1.442695, %v1157_v4  ;;  %3198 = vpow2.f32 %v1158_v8 }
 0x312   : > { %1784 = vmax.xlane.f32.xlu1 %v1783_v3  ;;  %v3835_v5 = vpop.f32.mrb[34].mxu0 }
 0x313   : > { %v2902_v6 = vpop.f32.mrb[35].mxu0  ;;  %v1786_v7 = vsel %vm1149_vm2, %v3835_v5, -inf  ;;  %3200 = vpow2.f32 %v1160_v9 }
 0x314   : > { %1787 = vmax.xlane.f32.xlu0 %v1786_v7 }
 0x318   : > { %v3839_v10 = vpop.f32.mrb[36].mxu0 }
 0x319   : > { %v2913_v11 = vpop.f32.mrb[37].mxu0  ;;  %v1916_v12 = vsel %vm1149_vm2, %v3839_v10, -inf }
 0x31a   : > { %1917 = vmax.xlane.f32.xlu1 %v1916_v12  ;;  %v3843_v13 = vpop.f32.mrb[38].mxu0 }
 0x31b   : > { %v2914_v14 = vpop.f32.mrb[39].mxu0  ;;  %v1919_v0 = vsel %vm1149_vm2, %v3843_v13, -inf  ;;  %v3851_v18 = vpop.eup %3198 }
 0x31c   : > { %1920 = vmax.xlane.f32.xlu0 %v1919_v0  ;;  %v1162_v23 = vsel %vm1149_vm2, %v3851_v18, 0.0 }
 0x31d   : > { %v3857_v22 = vpop.eup %3200 }
 0x31e   : > { %v1165_v24 = vsel %vm1149_vm2, %v3857_v22, 0.0 }
 0x320   : > { %v3847_v15 = vpop.f32.mrb[40].mxu0 }
 0x321   : > { %v2925_v16 = vpop.f32.mrb[41].mxu0  ;;  %v2038_v17 = vsel %vm1149_vm2, %v3847_v15, -inf }
 0x322   : > { %2039 = vmax.xlane.f32.xlu1 %v2038_v17  ;;  %v3853_v19 = vpop.f32.mrb[42].mxu0 }
 0x323   : > { %v2926_v31 = vpop.f32.mrb[43].mxu0  ;;  %v2041_v21 = vsel %vm1149_vm2, %v3853_v19, -inf }
 0x324   : > { %2042 = vmax.xlane.f32.xlu0 %v2041_v21 }
 0x326   : > { %1163 = vadd.xlane.f32.xlu1 %v1162_v23 }
 0x328   : > { %1166 = vadd.xlane.f32.xlu0 %v1165_v24 }
 0x337   : > { %1296 = vrot.lane.b32.xlu1 %v3750_v58, %s3465_s21 }
 0x37f   : > { %v1274_v32 = vpop.xlane.xlu0 %1273 }
 0x380   : > { %v1278_v33 = vsub.f32 %v3799_v35, %v1274_v32 }
 0x382   : > { %v1280_v34 = vmul.f32 1.442695, %v1278_v33 }
 0x383   : > { %v1277_v36 = vpop.xlane.xlu0 %1276 }
 0x384   : > { %3202 = vpow2.f32 %v1280_v34  ;;  %v1279_v37 = vsub.f32 %v3803_v38, %v1277_v36 }
 0x386   : > { %v1282_v39 = vmul.f32 1.442695, %v1279_v37 }
 0x387   : > { %v1408_v40 = vpop.xlane.xlu1 %1407 }
 0x388   : > { %3204 = vpow2.f32 %v1282_v39  ;;  %v1412_v58 = vsub.f32 %v3807_v41, %v1408_v40 }
 0x389   : > { %v1411_v42 = vpop.xlane.xlu0 %1410 }
 0x38a   : > { %v1414_v43 = vmul.f32 1.442695, %v1412_v58  ;;  %v1413_v45 = vsub.f32 %v3811_v44, %v1411_v42 }
 0x38c   : > { %3206 = vpow2.f32 %v1414_v43  ;;  %v1416_v46 = vmul.f32 1.442695, %v1413_v45 }
 0x38e   : > { %v3873_v48 = vpop.eup %3202  ;;  %3208 = vpow2.f32 %v1416_v46 }
 0x38f   : > { %v1530_v35 = vpop.xlane.xlu1 %1529  ;;  %v1284_v49 = vsel %vm1149_vm2, %v3873_v48, 0.0 }
 0x390   : > { %v1534_v38 = vsub.f32 %v3815_v47, %v1530_v35  ;;  %1285 = vadd.xlane.f32.xlu1 %v1284_v49 }
 0x391   : > { %v1533_v51 = vpop.xlane.xlu0 %1532 }
 0x392   : > { %v3878_v52 = vpop.eup %3204  ;;  %v1536_v41 = vmul.f32 1.442695, %v1534_v38  ;;  %v1535_v54 = vsub.f32 %v3819_v50, %v1533_v51 }
 0x393   : > { %v1287_v44 = vsel %vm1149_vm2, %v3878_v52, 0.0 }
 0x394   : > { %3210 = vpow2.f32 %v1536_v41  ;;  %v1538_v55 = vmul.f32 1.442695, %v1535_v54  ;;  %1288 = vadd.xlane.f32.xlu0 %v1287_v44 }
 0x396   : > { %v3883_v57 = vpop.eup %3206  ;;  %3212 = vpow2.f32 %v1538_v55 }
 0x397   : > { %v1663_v59 = vpop.xlane.xlu1 %1662  ;;  %v1418_v47 = vsel %vm1149_vm2, %v3883_v57, 0.0 }
 0x398   : > { %v3887_v61 = vpop.eup %3208  ;;  %v1667_v62 = vsub.f32 %v3823_v53, %v1663_v59  ;;  %1419 = vadd.xlane.f32.xlu1 %v1418_v47 }
 0x399   : > { %v1666_v63 = vpop.xlane.xlu0 %1665  ;;  %v1421_v50 = vsel %vm1149_vm2, %v3887_v61, 0.0 }
 0x39a   : > { %v1669_v2 = vmul.f32 1.442695, %v1667_v62  ;;  %v1668_v3 = vsub.f32 %v3827_v56, %v1666_v63  ;;  %1422 = vadd.xlane.f32.xlu0 %v1421_v50 }
 0x39c   : > { %3214 = vpow2.f32 %v1669_v2  ;;  %v1671_v4 = vmul.f32 1.442695, %v1668_v3 }
 0x39e   : > { %v3893_v6 = vpop.eup %3210  ;;  %3216 = vpow2.f32 %v1671_v4 }
 0x39f   : > { %v1785_v7 = vpop.xlane.xlu1 %1784  ;;  %v1540_v8 = vsel %vm1149_vm2, %v3893_v6, 0.0 }
 0x3a0   : > { %v3897_v9 = vpop.eup %3212  ;;  %v1789_v53 = vsub.f32 %v3831_v1, %v1785_v7  ;;  %1541 = vadd.xlane.f32.xlu1 %v1540_v8 }
 0x3a1   : > { %v1788_v11 = vpop.xlane.xlu0 %1787  ;;  %v1543_v12 = vsel %vm1149_vm2, %v3897_v9, 0.0 }
 0x3a2   : > { %v1791_v56 = vmul.f32 1.442695, %v1789_v53  ;;  %v1790_v14 = vsub.f32 %v3835_v5, %v1788_v11  ;;  %1544 = vadd.xlane.f32.xlu0 %v1543_v12 }
 0x3a4   : > { %3218 = vpow2.f32 %v1791_v56  ;;  %v1793_v0 = vmul.f32 1.442695, %v1790_v14 }
 0x3a6   : > { %v3903_v16 = vpop.eup %3214  ;;  %3220 = vpow2.f32 %v1793_v0 }
 0x3a7   : > { %v1918_v17 = vpop.xlane.xlu1 %1917  ;;  %v1673_v31 = vsel %vm1149_vm2, %v3903_v16, 0.0 }
 0x3a8   : > { %v3907_v21 = vpop.eup %3216  ;;  %v1922_v1 = vsub.f32 %v3839_v10, %v1918_v17  ;;  %1674 = vadd.xlane.f32.xlu1 %v1673_v31 }
 0x3a9   : > { %v1921_v23 = vpop.xlane.xlu0 %1920  ;;  %v1676_v24 = vsel %vm1149_vm2, %v3907_v21, 0.0 }
 0x3aa   : > { %v1924_v5 = vmul.f32 1.442695, %v1922_v1  ;;  %v1923_v25 = vsub.f32 %v3843_v13, %v1921_v23  ;;  %1677 = vadd.xlane.f32.xlu0 %v1676_v24 }
 0x3ac   : > { %3222 = vpow2.f32 %v1924_v5  ;;  %v1926_v26 = vmul.f32 1.442695, %v1923_v25 }
 0x3ae   : > { %v3913_v27 = vpop.eup %3218  ;;  %3224 = vpow2.f32 %v1926_v26 }
 0x3af   : > { %v2040_v29 = vpop.xlane.xlu1 %2039  ;;  %v1795_v32 = vsel %vm1149_vm2, %v3913_v27, 0.0 }
 0x3b0   : > { %v3917_v33 = vpop.eup %3220  ;;  %v2044_v10 = vsub.f32 %v3847_v15, %v2040_v29  ;;  %1796 = vadd.xlane.f32.xlu0 %v1795_v32 }
 0x3b1   : > { %v2043_v34 = vpop.xlane.xlu0 %2042  ;;  %v1798_v13 = vsel %vm1149_vm2, %v3917_v33, 0.0 }
 0x3b2   : > { %v2046_v36 = vmul.f32 1.442695, %v2044_v10  ;;  %v2045_v54 = vsub.f32 %v3853_v19, %v2043_v34 }
 0x3b3   : > { %v1164_v37 = vpop.xlane.xlu1 %1163 }
 0x3b4   : > { %3226 = vpow2.f32 %v2046_v36  ;;  %1799 = vadd.xlane.f32.xlu0 %v1798_v13  ;;  %v2048_v44 = vmul.f32 1.442695, %v2045_v54  ;;  %v3169_v54 = vld [vmem:[#allocation8 + $0x8] sm:$0xff]  }
 0x3b5   : > { %3228 = vrcp.f32 %v1164_v37  ;;  %v1167_v39 = vpop.xlane.xlu0 %1166 }
 0x3b6   : > { %v3922_v40 = vpop.eup %3222  ;;  %3230 = vrcp.f32 %v1167_v39 }
 0x3b7   : > { %v1928_v58 = vsel %vm1149_vm2, %v3922_v40, 0.0  ;;  %v1297_v41 = vpop.permute.xlu1 %1296  ;;  %3232 = vpow2.f32 %v2048_v44  ;;  %v3171_v44 = vld [vmem:[#allocation8 + $0x10] sm:$0xff]  }
 0x3b8   : > { %v3926_v42 = vpop.eup %3224  ;;  %1929 = vadd.xlane.f32.xlu0 %v1928_v58 }
 0x3b9   : > { %1552 = vrot.lane.b32.xlu1 %v3752_v60, %s3465_s21  ;;  %v1931_v15 = vsel %vm1149_vm2, %v3926_v42, 0.0 }
 0x3bc   : > { %1932 = vadd.xlane.f32.xlu0 %v1931_v15 }
 0x3be   : > { %v3932_v43 = vpop.eup %3226 }
 0x3bf   : > { %v3229_v45 = vpop.eup %3228  ;;  %v2050_v46 = vsel %vm1149_vm2, %v3932_v43, 0.0 }
 0x3c0   : > { %2051 = vadd.xlane.f32.xlu0 %v2050_v46  ;;  %v3231_v35 = vpop.eup %3230  ;;  %v1170_v49 = vmul.f32 %v3229_v45, %v3851_v18 }
 0x3c1   : > { %v1171_v38 = vmul.f32 %v3231_v35, %v3857_v22  ;;  %v3945_v18 = vpop.eup %3232 }
 0x3c2   : > { %v2053_v22 = vsel %vm1149_vm2, %v3945_v18, 0.0 }
 0x3c3   : > { %v1172_v51 = vpack.c.bf16 %v1171_v38, %v1170_v49  ;;  %v3166_v38 = vld [vmem:[#allocation8 + $0x40] sm:$0xff]  }
 0x3c4   : > { %2793 = vmatprep.subr.bf16.mxu0 %v3166_v38 }
 0x3c5   : > { %2846 = vmatmul.mubr.msk.bf16.vlgmr.msra.gmra.mrb[12].mxu1 %vm1149_vm2, %v1172_v51  ;;  %v3167_v51 = vld [vmem:[#allocation8] sm:$0xff]  }
 0x3c6   : > { %2856 = vmatpush3.bf16.msra.mxu1 %v1297_v41  ;;  %2857 = vmatprep.mubr.msk.bf16.mxu1 %vm3464_vm0, %v3463_v20  ;;  %v3168_v41 = vld [vmem:[#allocation8 + $0x48] sm:$0xff]  }
 0x3c7   : > { %2867 = vmatprep.subr.bf16.mxu1 %v3463_v20  ;;  %2794 = vmatpush3.bf16.msra.mxu0 %v3167_v51 }
 0x3c8   : > { %2795 = vmatprep.subr.bf16.mxu0 %v3168_v41 }
 0x3cb   : > { %2796 = vmatpush3.bf16.msra.mxu0 %v3169_v54 }
 0x3d6   : > { %1807 = vrot.lane.b32.xlu0 %v3865_v28, %s3465_s21 }
 0x3da   : > { %2062 = vrot.lane.b32.xlu0 %v3867_v30, %s3465_s21 }
 0x3dd   : > { %2054 = vadd.xlane.f32.xlu1 %v2053_v22  ;;  %v3173_v22 = vld [vmem:[#allocation8 + $0x18] sm:$0xff]  }
 0x41d   : > { %v1286_v19 = vpop.xlane.xlu1 %1285 }
 0x41e   : > { %3234 = vrcp.f32 %v1286_v19  ;;  %v3174_v19 = vld [vmem:[#allocation8 + $0x60] sm:$0xff]  }
 0x421   : > { %v1289_v55 = vpop.xlane.xlu0 %1288 }
 0x422   : > { %3236 = vrcp.f32 %v1289_v55 }
 0x425   : > { %v1420_v59 = vpop.xlane.xlu1 %1419 }
 0x426   : > { %3238 = vrcp.f32 %v1420_v59 }
 0x427   : > { %v1423_v47 = vpop.xlane.xlu0 %1422 }
 0x428   : > { %3240 = vrcp.f32 %v1423_v47  ;;  %v3235_v62 = vpop.eup %3234 }
 0x429   : > { %v1292_v50 = vmul.f32 %v3235_v62, %v3873_v48 }
 0x42c   : > { %v3237_v63 = vpop.eup %3236 }
 0x42d   : > { %v1293_v2 = vmul.f32 %v3237_v63, %v3878_v52  ;;  %v1542_v3 = vpop.xlane.xlu1 %1541  ;;  %v3175_v63 = vld [vmem:[#allocation8 + $0x20] sm:$0xff]  }
 0x42e   : > { %3242 = vrcp.f32 %v1542_v3  ;;  %v3177_v3 = vld [vmem:[#allocation8 + $0x28] sm:$0xff]  }
 0x42f   : > { %v1545_v4 = vpop.xlane.xlu0 %1544  ;;  %v1294_v7 = vpack.c.bf16 %v1293_v2, %v1292_v50  ;;  %v3176_v50 = vld [vmem:[#allocation8 + $0x68] sm:$0xff]  }
 0x430   : > { %3244 = vrcp.f32 %v1545_v4  ;;  %v3239_v8 = vpop.eup %3238  ;;  %v3178_v4 = vld [vmem:[#allocation8 + $0x70] sm:$0xff]  }
 0x431   : > { %2858 = vmatmul.mubr.msk.bf16.vlgmr.msra.gmra.mrb[16].mxu1 %vm1149_vm2, %v1294_v7  ;;  %v1426_v48 = vmul.f32 %v3239_v8, %v3883_v57 }
 0x432   : > { %v3241_v53 = vpop.eup %3240  ;;  %2868 = vmatpush3.bf16.msra.mxu1 %v3752_v60  ;;  %2869 = vmatprep.mubr.msk.bf16.mxu1 %vm3464_vm0, %v3463_v20 }
 0x433   : > { %v1427_v11 = vmul.f32 %v3241_v53, %v3887_v61  ;;  %2879 = vmatprep.subr.bf16.mxu1 %v3463_v20  ;;  %v3179_v53 = vld [vmem:[#allocation8 + $0x30] sm:$0xff]  }
 0x435   : > { %v1675_v52 = vpop.xlane.xlu1 %1674  ;;  %v1428_v56 = vpack.c.bf16 %v1427_v11, %v1426_v48  ;;  %v3180_v48 = vld [vmem:[#allocation8 + $0x78] sm:$0xff]  }
 0x436   : > { %3246 = vrcp.f32 %v1675_v52  ;;  %v3181_v52 = vld [vmem:[#allocation8 + $0x38] sm:$0xff]  }
 0x437   : > { %v1678_v12 = vpop.xlane.xlu0 %1677 }
 0x438   : > { %3248 = vrcp.f32 %v1678_v12  ;;  %v3243_v14 = vpop.eup %3242 }
 0x439   : > { %v1553_v0 = vpop.permute.xlu1 %1552  ;;  %2870 = vmatmul.mubr.msk.bf16.vlgmr.msra.gmra.mrb[20].mxu1 %vm1149_vm2, %v1428_v56  ;;  %v1548_v57 = vmul.f32 %v3243_v14, %v3893_v6 }
 0x43a   : > { %v3245_v17 = vpop.eup %3244  ;;  %2880 = vmatpush3.bf16.msra.mxu1 %v1553_v0  ;;  %2881 = vmatprep.mubr.msk.bf16.mxu1 %vm3464_vm0, %v3463_v20 }
 0x43b   : > { %v1549_v60 = vmul.f32 %v3245_v17, %v3897_v9  ;;  %2891 = vmatprep.subr.bf16.mxu1 %v3463_v20 }
 0x43d   : > { %v1797_v61 = vpop.xlane.xlu0 %1796  ;;  %v1550_v31 = vpack.c.bf16 %v1549_v60, %v1548_v57  ;;  %v3182_v60 = vld [vmem:[#allocation8 + $0xc0] sm:$0xff]  }
 0x43e   : > { %v3183_v57 = vld [vmem:[#allocation8 + $0x80] sm:$0xff]  }
 0x440   : > { %v3247_v1 = vpop.eup %3246 }
 0x441   : > { %2882 = vmatmul.mubr.msk.bf16.vlgmr.msra.gmra.mrb[24].mxu1 %vm1149_vm2, %v1550_v31  ;;  %v1800_v23 = vpop.xlane.xlu0 %1799  ;;  %v1681_v6 = vmul.f32 %v3247_v1, %v3903_v16 }
 0x442   : > { %v3249_v24 = vpop.eup %3248  ;;  %2892 = vmatpush3.bf16.msra.mxu1 %v3865_v28  ;;  %3250 = vrcp.f32 %v1800_v23  ;;  %2893 = vmatprep.mubr.msk.bf16.mxu1 %vm3464_vm0, %v3463_v20 }
 0x443   : > { %v1682_v5 = vmul.f32 %v3249_v24, %v3907_v21  ;;  %2903 = vmatprep.subr.bf16.mxu1 %v3463_v20  ;;  %3252 = vrcp.f32 %v1797_v61  ;;  %v3184_v61 = vld [vmem:[#allocation8 + $0xc8] sm:$0xff]  }
 0x444   : > { %v3185_v24 = vld [vmem:[#allocation8 + $0x88] sm:$0xff]  }
 0x445   : > { %v1930_v9 = vpop.xlane.xlu0 %1929  ;;  %v1683_v25 = vpack.c.bf16 %v1682_v5, %v1681_v6  ;;  %v3186_v5 = vld [vmem:[#allocation8 + $0xd0] sm:$0xff]  }
 0x446   : > { %v3187_v6 = vld [vmem:[#allocation8 + $0x90] sm:$0xff]  }
 0x449   : > { %2894 = vmatmul.mubr.msk.bf16.vlgmr.msra.gmra.mrb[28].mxu1 %vm1149_vm2, %v1683_v25  ;;  %v1933_v26 = vpop.xlane.xlu0 %1932  ;;  %v3189_v25 = vld [vmem:[#allocation8 + $0x98] sm:$0xff]  }
 0x44a   : > { %3254 = vrcp.f32 %v1933_v26  ;;  %2905 = vmatprep.mubr.msk.bf16.mxu1 %vm3464_vm0, %v3463_v20 }
 0x44b   : > { %3256 = vrcp.f32 %v1930_v9  ;;  %v3188_v9 = vld [vmem:[#allocation8 + $0xd8] sm:$0xff]  }
 0x44c   : > { %v3251_v28 = vpop.eup %3250 }
 0x44d   : > { %v2052_v29 = vpop.xlane.xlu0 %2051  ;;  %v3253_v32 = vpop.eup %3252  ;;  %v1804_v21 = vmul.f32 %v3251_v28, %v3917_v33 }
 0x44e   : > { %v1803_v10 = vmul.f32 %v3253_v32, %v3913_v27  ;;  %3258 = vrcp.f32 %v2052_v29 }
 0x450   : > { %v1805_v16 = vpack.c.bf16 %v1804_v21, %v1803_v10 }
 0x451   : > { %v1808_v34 = vpop.permute.xlu0 %1807 }
 0x452   : > { %2904 = vmatpush3.bf16.msra.mxu1 %v1808_v34 }
 0x453   : > { %2915 = vmatprep.subr.bf16.mxu1 %v3463_v20 }
 0x454   : > { %v3255_v36 = vpop.eup %3254 }
 0x455   : > { %2906 = vmatmul.mubr.msk.bf16.vlgmr.msra.gmra.mrb[32].mxu1 %vm1149_vm2, %v1805_v16  ;;  %v3257_v37 = vpop.eup %3256  ;;  %v1937_v13 = vmul.f32 %v3255_v36, %v3926_v42  ;;  %v2063_v39 = vpop.permute.xlu0 %2062  ;;  %v3190_v36 = vld [vmem:[#allocation8 + $0xe0] sm:$0xff]  }
 0x456   : > { %2916 = vmatpush3.bf16.msra.mxu1 %v3867_v30  ;;  %2917 = vmatprep.mubr.msk.bf16.mxu1 %vm3464_vm0, %v3463_v20  ;;  %v1936_v27 = vmul.f32 %v3257_v37, %v3922_v40  ;;  %v3191_v37 = vld [vmem:[#allocation8 + $0xa0] sm:$0xff]  }
 0x457   : > { %2927 = vmatprep.subr.bf16.mxu1 %v3463_v20 }
 0x458   : > { %v1938_v33 = vpack.c.bf16 %v1937_v13, %v1936_v27  ;;  %v3259_v30 = vpop.eup %3258  ;;  %v3192_v13 = vld [vmem:[#allocation8 + $0xe8] sm:$0xff]  }
 0x459   : > { %v2058_v45 = vmul.f32 %v3259_v30, %v3932_v43  ;;  %v3170_v43 = vld [vmem:[#allocation8 + $0x50] sm:$0xff]   ;;  %v3193_v27 = vld [vmem:[#allocation8 + $0xa8] sm:$0xff]  }
 0x45a   : > { %2797 = vmatprep.subr.bf16.mxu0 %v3170_v43 }
 0x45b   : > { %2798 = vmatpush3.bf16.msra.mxu0 %v3171_v44 }
 0x45d   : > { %2918 = vmatmul.mubr.msk.bf16.vlgmr.msra.gmra.mrb[36].mxu1 %vm1149_vm2, %v1938_v33  ;;  %v3194_v33 = vld [vmem:[#allocation8 + $0xf0] sm:$0xff]  }
 0x45e   : > { %2928 = vmatpush3.bf16.msra.mxu1 %v2063_v39  ;;  %2929 = vmatprep.mubr.msk.bf16.mxu1 %vm3464_vm0, %v3463_v20  ;;  %v3195_v39 = vld [vmem:[#allocation8 + $0xb0] sm:$0xff]  }
 0x45f   : > { %2815 = vmatprep.subr.bf16.mxu1 %v3182_v60 }
 0x46a   : > { %v2055_v58 = vpop.xlane.xlu1 %2054 }
 0x46b   : > { %3260 = vrcp.f32 %v2055_v58  ;;  %v3196_v58 = vld [vmem:[#allocation8 + $0xf8] sm:$0xff]  }
 0x475   : > { %v3261_v15 = vpop.eup %3260 }
 0x476   : > { %v2059_v42 = vmul.f32 %v3261_v15, %v3945_v18  ;;  %v3172_v18 = vld [vmem:[#allocation8 + $0x58] sm:$0xff]  }
 0x477   : > { %2799 = vmatprep.subr.bf16.mxu0 %v3172_v18 }
 0x478   : > { %v2060_v46 = vpack.c.bf16 %v2059_v42, %v2058_v45  ;;  %2800 = vmatpush3.bf16.msra.mxu0 %v3173_v22  ;;  %v3197_v42 = vld [vmem:[#allocation8 + $0xb8] sm:$0xff]  }
 0x479   : > { %2801 = vmatprep.subr.bf16.mxu0 %v3174_v19 }
 0x47a   : > { %2930 = vmatmul.mubr.msk.bf16.vlgmr.msra.gmra.mrb[40].mxu1 %vm1149_vm2, %v2060_v46 }
 0x47b   : > { %2816 = vmatpush3.bf16.msra.mxu1 %v3183_v57 }
 0x47c   : > { %2802 = vmatpush3.bf16.msra.mxu0 %v3175_v63  ;;  %2817 = vmatprep.subr.bf16.mxu1 %v3184_v61 }
 0x47d   : > { %2803 = vmatprep.subr.bf16.mxu0 %v3176_v50 }
 0x47f   : > { %2818 = vmatpush3.bf16.msra.mxu1 %v3185_v24 }
 0x480   : > { %2804 = vmatpush3.bf16.msra.mxu0 %v3177_v3  ;;  %2819 = vmatprep.subr.bf16.mxu1 %v3186_v5 }
 0x481   : > { %2805 = vmatprep.subr.bf16.mxu0 %v3178_v4 }
 0x483   : > { %2820 = vmatpush3.bf16.msra.mxu1 %v3187_v6 }
 0x484   : > { %2806 = vmatpush3.bf16.msra.mxu0 %v3179_v53  ;;  %2821 = vmatprep.subr.bf16.mxu1 %v3188_v9 }
 0x485   : > { %2807 = vmatprep.subr.bf16.mxu0 %v3180_v48  ;;  %v2721_v48 = vld [vmem:[#allocation9] ss:$0 sm:$0xff] }
 0x487   : > { %2822 = vmatpush3.bf16.msra.mxu1 %v3189_v25 }
 0x488   : > { %2808 = vmatpush3.bf16.msra.mxu0 %v3181_v52  ;;  %2823 = vmatprep.subr.bf16.mxu1 %v3190_v36 }
 0x48b   : > { %2824 = vmatpush3.bf16.msra.mxu1 %v3191_v37 }
 0x48c   : > { %2825 = vmatprep.subr.bf16.mxu1 %v3192_v13 }
 0x48f   : > { %2826 = vmatpush3.bf16.msra.mxu1 %v3193_v27 }
 0x490   : > { %2827 = vmatprep.subr.bf16.mxu1 %v3194_v33 }
 0x493   : > { %2828 = vmatpush3.bf16.msra.mxu1 %v3195_v39 }
 0x494   : > { %2829 = vmatprep.subr.bf16.mxu1 %v3196_v58 }
 0x497   : > { %2830 = vmatpush3.bf16.msra.mxu1 %v3197_v42 }
 0x498   : > { %v1210_v40 = vpop.f32.mrb[12].mxu1 }
 0x499   : > { %1217 = vst.msk [vmem:[#allocation2] sm:$0xff] %vm1101_vm1, %v1210_v40  ;;  %v2847_v35 = vpop.f32.mrb[13].mxu1 }
 0x49a   : > { %v1213_v49 = vpop.f32.mrb[14].mxu1 }
 0x49b   : > { %1218 = vst.msk [vmem:[#allocation2 + $0x20] sm:$0xff] %vm1101_vm1, %v1213_v49  ;;  %v2848_v20 = vpop.f32.mrb[15].mxu1 }
 0x504   : > { %v1336_v55 = vpop.f32.mrb[16].mxu1 }
 0x505   : > { %1345 = vrot.lane.b32.xlu0 %v1336_v55, %s3465_s21  ;;  %v2859_v59 = vpop.f32.mrb[17].mxu1 }
 0x506   : > { %v1339_v47 = vpop.f32.mrb[18].mxu1 }
 0x507   : > { %1347 = vrot.lane.b32.xlu1 %v1339_v47, %s3465_s21  ;;  %v2860_v62 = vpop.f32.mrb[19].mxu1 }
 0x50c   : > { %v1466_v2 = vpop.f32.mrb[20].mxu1 }
 0x50d   : > { %1473 = vst.msk [vmem:[#allocation2 + $0x8] sm:$0xff] %vm1101_vm1, %v1466_v2  ;;  %v2871_v7 = vpop.f32.mrb[21].mxu1 }
 0x50e   : > { %v1469_v8 = vpop.f32.mrb[22].mxu1 }
 0x50f   : > { %1474 = vst.msk [vmem:[#allocation2 + $0x28] sm:$0xff] %vm1101_vm1, %v1469_v8  ;;  %v2872_v11 = vpop.f32.mrb[23].mxu1 }
 0x514   : > { %v1592_v12 = vpop.f32.mrb[24].mxu1 }
 0x515   : > { %1601 = vrot.lane.b32.xlu0 %v1592_v12, %s3465_s21  ;;  %v2883_v56 = vpop.f32.mrb[25].mxu1 }
 0x516   : > { %v1595_v14 = vpop.f32.mrb[26].mxu1 }
 0x517   : > { %v2884_v0 = vpop.f32.mrb[27].mxu1 }
 0x519   : > { %1603 = vrot.lane.b32.xlu0 %v1595_v14, %s3465_s21 }
 0x51c   : > { %v1721_v17 = vpop.f32.mrb[28].mxu1 }
 0x51d   : > { %1728 = vst.msk [vmem:[#allocation2 + $0x10] sm:$0xff] %vm1101_vm1, %v1721_v17  ;;  %v2895_v31 = vpop.f32.mrb[29].mxu1 }
 0x51e   : > { %v1724_v1 = vpop.f32.mrb[30].mxu1 }
 0x51f   : > { %1729 = vst.msk [vmem:[#allocation2 + $0x30] sm:$0xff] %vm1101_vm1, %v1724_v1  ;;  %v2896_v23 = vpop.f32.mrb[31].mxu1 }
 0x528   : > { %v1847_v26 = vpop.f32.mrb[32].mxu1 }
 0x529   : > { %1856 = vrot.lane.b32.xlu0 %v1847_v26, %s3465_s21  ;;  %v2907_v28 = vpop.f32.mrb[33].mxu1 }
 0x52a   : > { %v1850_v29 = vpop.f32.mrb[34].mxu1 }
 0x52b   : > { %v2908_v32 = vpop.f32.mrb[35].mxu1 }
 0x530   : > { %v1976_v21 = vpop.f32.mrb[36].mxu1 }
 0x531   : > { %1983 = vst.msk [vmem:[#allocation2 + $0x18] sm:$0xff] %vm1101_vm1, %v1976_v21  ;;  %v2919_v10 = vpop.f32.mrb[37].mxu1 }
 0x532   : > { %v1979_v34 = vpop.f32.mrb[38].mxu1 }
 0x533   : > { %1984 = vst.msk [vmem:[#allocation2 + $0x38] sm:$0xff] %vm1101_vm1, %v1979_v34  ;;  %v2920_v16 = vpop.f32.mrb[39].mxu1 }
 0x54d   : > { %v2102_v30 = vpop.f32.mrb[40].mxu1 }
 0x54e   : > { %2111 = vrot.lane.b32.xlu0 %v2102_v30, %s3465_s21  ;;  %v2931_v15 = vpop.f32.mrb[41].mxu1 }
 0x54f   : > { %v2105_v45 = vpop.f32.mrb[42].mxu1 }
 0x550   : > { %v2932_v46 = vpop.f32.mrb[43].mxu1 }
 0x552   : > { %2113 = vrot.lane.b32.xlu0 %v2105_v45, %s3465_s21 }
 0x556   : > { %1858 = vrot.lane.b32.xlu0 %v1850_v29, %s3465_s21 }
 0x577   : > { %v1346_v40 = vpop.permute.xlu0 %1345 }
 0x578   : > { %1352 = vst.msk [vmem:[#allocation2] sm:$0xff] %vm1351_vm3, %v1346_v40 }
 0x579   : > { %v1348_v35 = vpop.permute.xlu1 %1347 }
 0x57a   : > { %1353 = vst.msk [vmem:[#allocation2 + $0x20] sm:$0xff] %vm1351_vm3, %v1348_v35 }
 0x57f   : > { %v2119_v43 = vld [vmem:[#allocation2] sm:$0xff] }
 0x581   : > { %v2123_v38 = vld [vmem:[#allocation2 + $0x20] sm:$0xff] }
 0x582   : > { %v2127_v44 = vpack.c.bf16 %v2123_v38, %v2119_v43 }
 0x587   : > { %v1602_v49 = vpop.permute.xlu0 %1601 }
 0x588   : > { %1607 = vst.msk [vmem:[#allocation2 + $0x8] sm:$0xff] %vm1351_vm3, %v1602_v49 }
 0x58b   : > { %v1604_v20 = vpop.permute.xlu0 %1603 }
 0x58c   : > { %1608 = vst.msk [vmem:[#allocation2 + $0x28] sm:$0xff] %vm1351_vm3, %v1604_v20 }
 0x58f   : > { %v2120_v51 = vld [vmem:[#allocation2 + $0x8] sm:$0xff] }
 0x593   : > { %v2124_v41 = vld [vmem:[#allocation2 + $0x28] sm:$0xff] }
 0x594   : > { %v2128_v54 = vpack.c.bf16 %v2124_v41, %v2120_v51 }
 0x596   : > { %2426 = vmatprep.mubr.bf16.mxu0 %v2128_v54 }
 0x597   : > { %2427 = vmatmul.mubr.bf16.vlgmr.msra.gmra.mrb[44].mxu0 %v2127_v44 }
 0x59b   : > { %v1857_v18 = vpop.permute.xlu0 %1856 }
 0x59c   : > { %1862 = vst.msk [vmem:[#allocation2 + $0x10] sm:$0xff] %vm1351_vm3, %v1857_v18 }
 0x5a3   : > { %v2121_v63 = vld [vmem:[#allocation2 + $0x10] sm:$0xff] }
 0x5c0   : > { %v2112_v22 = vpop.permute.xlu0 %2111 }
 0x5c1   : > { %2117 = vst.msk [vmem:[#allocation2 + $0x18] sm:$0xff] %vm1351_vm3, %v2112_v22 }
 0x5c4   : > { %v2114_v19 = vpop.permute.xlu0 %2113 }
 0x5c5   : > { %2118 = vst.msk [vmem:[#allocation2 + $0x38] sm:$0xff] %vm1351_vm3, %v2114_v19 }
 0x5c8   : > { %v1859_v55 = vpop.permute.xlu0 %1858  ;;  %v2122_v59 = vld [vmem:[#allocation2 + $0x18] sm:$0xff] }
 0x5c9   : > { %1863 = vst.msk [vmem:[#allocation2 + $0x30] sm:$0xff] %vm1351_vm3, %v1859_v55 }
 0x5cc   : > { %v2126_v47 = vld [vmem:[#allocation2 + $0x38] sm:$0xff] }
 0x5cd   : > { %v2130_v62 = vpack.c.bf16 %v2126_v47, %v2122_v59 }
 0x5cf   : > { %2467 = vmatprep.mubr.bf16.mxu1 %v2130_v62 }
 0x5d0   : > { %v2125_v50 = vld [vmem:[#allocation2 + $0x30] sm:$0xff] }
 0x5d1   : > { %v2129_v2 = vpack.c.bf16 %v2125_v50, %v2121_v63 }
 0x5d3   : > { %2468 = vmatmul.mubr.bf16.vlgmr.msra.gmra.mrb[44].mxu1 %v2129_v2 }
 0x66a   : > { %v2809_v3 = vpop.f32.mrb[44].mxu0 }
 0x66b   : > { %v2810_v4 = vpop.f32.mrb[45].mxu0 }
 0x66c   : > { %v2811_v7 = vadd.f32 %v2810_v4, %v2809_v3  ;;  %v2812_v8 = vpop.f32.mrb[46].mxu0 }
 0x66d   : > { %v2813_v53 = vpop.f32.mrb[47].mxu0 }
 0x66e   : > { %v2814_v11 = vadd.f32 %v2813_v53, %v2812_v8  ;;  %v2429_v56 = vadd.f32 %v2811_v7, %v2721_v48 }
 0x670   : > { %v2432_v60 = vadd.f32 %v2814_v11, %v2721_v48 }
 0x6a6   : > { %v2831_v52 = vpop.f32.mrb[44].mxu1 }
 0x6a7   : > { %v2832_v12 = vpop.f32.mrb[45].mxu1 }
 0x6a8   : > { %v2833_v14 = vadd.f32 %v2832_v12, %v2831_v52  ;;  %v2834_v0 = vpop.f32.mrb[46].mxu1 }
 0x6a9   : > { %v2835_v17 = vpop.f32.mrb[47].mxu1 }
 0x6aa   : > { %v2470_v57 = vadd.f32 %v2833_v14, %v2429_v56  ;;  %v2836_v61 = vadd.f32 %v2835_v17, %v2834_v0 }
 0x6ac   : > { %2476 = vst [vmem:[%s257_s23] sm:$0xff] %v2470_v57  ;;  %v2473_v31 = vadd.f32 %v2836_v61, %v2432_v60 }
 0x6ae   : > { %2477 = vst [vmem:[%s257_s23 + $0x8] sm:$0xff] %v2473_v31 }
 0x6af   : > { %3389 = shalt.err (!%p3386_p4)
}
 0x6b0   : > { %s3390_s5 = scalar_lea.hbm %s4024_s24, 256  ;;  %s3394_s8 = scalar_lea.hbm %s4072_s4, 512 }
 0x6b1   : > { %p3391_p9 = scmp.ne.s32.totalorder %s4024_s24, %s3390_s5  ;;  %p3395_p8 = scmp.lt.u32.totalorder %s4024_s24, %s4072_s4 }
 0x6b2   : > { %p3396_p13 = scmp.lt.u32.totalorder %s3394_s8, %s3390_s5  ;;  %p3398_p10 = scmp.lt.u32.totalorder %s3390_s5, %s4024_s24 }
 0x6b3   : > { %p3392_p0 = pnand %p3391_p9, %p3636_p5 }
 0x6b4   : > { %p3397_p6 = por %p3396_p13, %p3395_p8 }
 0x6b5   : > { %p3393_p11 = pneg %p3392_p0 }
 0x6b6   : > { %p3399_p3 = por %p3398_p10, %p3397_p6 }
 0x6b8   : > { %p3400_p7 = pnand %p3399_p3, %p3393_p11 }
 0x6ba   : > { %3403 = shalt.err (!%p3400_p7)
}
 0x6bb   : > { %s3467_s23 = smov 128   ;;  %s3468_s6 = smov 8  }
 0x6bc   : > { %2947 = dma.vmem_to_hbm [thread:$0]  (%p3636_p5), %s4019_s14, 256, %s4024_s24, %s2479_s13, %s3467_s23, %s3467_s23, %s3468_s6  }
 0x6bd PF: > { %s2507_s7 = sand.u32 1, %s3438_s15   ;;  %p4090_p12 = scmp.ne.s32.totalorder %s4077_s22, 0 }
 0x6be   : > { %p4091_p2 = scmp.ge.s32.totalorder %s3450_s18, 2  ;;  %s2508_s28 = scalar_lea.sflag [#allocation5], %s2507_s7 }
 0x6c0   : > { %p2964_p1 = pnand %p4091_p2, %p4090_p12 }
 0x6c2   : > { %3433 = dma.done.wait (!%p2964_p1), %s2508_s28, 256  }
 0x6c3   : > { %3435 = vsyncadd (!%p2964_p1), %s2508_s28, 4294967040  ;;  %p19_p4 = scmp.ge.s32.totalorder %s3604_s20, 4   ;;  %s4092_s15 = smov %s3442_s16 }
 0x6c4   : > { %s4093_s16 = smov %s3446_s17  ;;  %s4094_s17 = smov %s3632_s26 }
 0x6c5   : > { %s4095_s18 = smov %s3604_s20  ;;  %21 = sbr.rel (!%p19_p4) target bundleno = 7 (0x7), region = 93 }
 0x6cc   :  { %2513 = vsyncpa [#allocation4], 1 }
 0x6cd   :  { %2515 = vsyncpa [#allocation4 + $0x1], 1 }
 0x6ce   :  { %2516 = vsyncpa [#allocation7], 1 }
 0x6cf   :  { %2517 = vsyncpa [#allocation10], 1 }
 0x6d0   :  { %2518 = vsyncpa [#allocation5], 1 }
 0x6d1   :  { %2520 = vsyncpa [#allocation5 + $0x1], 1 }

</bundles_post_ra>
